<compile_context>
chip_gen: v7x
topology: tpu7x:2x2x1
jax: 0.10.0
libtpu: 0.0.40
codegen_flags: <defaults>
</compile_context>

<pallas_src>
import jax
import jax.numpy as jnp
from jax import lax
from jax.experimental import pallas as pl
from jax.experimental.pallas import tpu as pltpu


# ---------------------------------------------------------------------------
# Kernels
# ---------------------------------------------------------------------------

def _dwsep_mxu_kernel(xs_ref, wf_ref, o_ref):
    """Fused depthwise(3x3)+pointwise(1x1) conv on one (batch, H-strip) tile, MXU path.

    xs_ref : (1, TH+2, W+2, C)   bf16 input strip, 2-row halo included by the DMA
    wf_ref : (9, C, Cout)        bf16 fused per-tap weights (tap = dh*3 + dw)
    o_ref  : (1, TH, W, Cout)    output tile (true Cout lanes, no channel padding)
    """
    _, TH2, Wp, C = xs_ref.shape
    TH, W = TH2 - 2, Wp - 2
    Cout = o_ref.shape[-1]
    taps = [(dh, dw) for dh in range(3) for dw in range(3)]

    if C % 128 == 0:
        # Lane-aligned channels: build the im2col lhs (P, 9C) with a cheap aligned concat and
        # run a single K=9C matmul -> best MXU utilization.
        lhs = jnp.concatenate(
            [xs_ref[0, dh:dh + TH, dw:dw + W, :] for dh, dw in taps], axis=-1)
        acc = jnp.dot(lhs.reshape(TH * W, 9 * C),
                      wf_ref[...].reshape(9 * C, Cout),
                      preferred_element_type=jnp.float32)
    else:
        # Unaligned C: an unaligned (P, 9C) im2col would force a lane repack of the whole
        # window; instead run 9 accumulating bf16 matmuls straight off the input block.
        acc = jnp.zeros((TH * W, Cout), jnp.float32)
        for t, (dh, dw) in enumerate(taps):
            lhs = xs_ref[0, dh:dh + TH, dw:dw + W, :].reshape(TH * W, C)
            acc = acc + jnp.dot(lhs, wf_ref[t],
                                preferred_element_type=jnp.float32)

    o_ref[0] = acc.reshape(TH, W, Cout).astype(o_ref.dtype)


def _dwsep_small_kernel(xs_ref, wd_ref, wp_ref, o_ref):
    """Small-channel fallback: VPU depthwise (9 shifted FMAs) + small pointwise matmul.

    xs_ref : (1, TH+2, W+2, C)  input strip (original dtype)
    wd_ref : (9, k, C)          depthwise taps, [tap, j, c] = wd[c*k + j, 0, dh, dw]
    wp_ref : (k, C, Cout)       pointwise,       [j, c, o]  = wp[o, c*k + j]
    o_ref  : (1, TH, W, Cout)
    """
    _, TH2, Wp, C = xs_ref.shape
    TH, W = TH2 - 2, Wp - 2
    kmult = wd_ref.shape[1]
    Cout = o_ref.shape[-1]

    out = jnp.zeros((TH * W, Cout), jnp.float32)
    for j in range(kmult):
        z = jnp.zeros((TH, W, C), jnp.float32)
        for dh in range(3):
            for dw in range(3):
                w_tap = wd_ref[dh * 3 + dw, j:j + 1, :].astype(jnp.float32)   # (1, C)
                z = z + xs_ref[0, dh:dh + TH, dw:dw + W, :].astype(jnp.float32) * w_tap
        out = out + jnp.dot(z.reshape(TH * W, C),
                            wp_ref[j].astype(jnp.float32),
                            preferred_element_type=jnp.float32)

    o_ref[0] = out.reshape(TH, W, Cout).astype(o_ref.dtype)


# ---------------------------------------------------------------------------
# Tiling helpers
# ---------------------------------------------------------------------------

def _vmem_capacity_bytes():
    try:
        return int(pltpu.get_tpu_info().vmem_capacity_bytes)
    except Exception:
        return 64 * 1024 * 1024          # v7x-safe default when the query is unavailable


def _choose_tile_h(H, n_batch, per_row_bytes, fixed_bytes):
    """Largest H-strip whose per-step VMEM footprint fits the budget.

    Guarantees >= 2 grid steps on a parallel axis when N == 1 so both v7x TensorCores get work.
    """
    budget = int(0.6 * _vmem_capacity_bytes())
    min_steps = 2 if n_batch < 2 else 1
    for th in (256, 128, 64, 32, 16, 8, 4, 2, 1):
        if th > H and th != 1:
            continue
        if th > 1 and -(-H // th) < min_steps:
            continue
        if fixed_bytes + th * per_row_bytes <= budget:
            return th
    # TODO(synk): add a W / Cout tile axis if even a single-row strip overflows VMEM.
    return 1


# ---------------------------------------------------------------------------
# Wrapper
# ---------------------------------------------------------------------------

def depthwise_separable_conv2d(x_nchw, w_depthwise, w_pointwise, k=1):
    """x_nchw: (N, C, H, W); w_depthwise: (C*k, 1, 3, 3); w_pointwise: (Cout, C*k, 1, 1)."""
    N, C, H, W = x_nchw.shape
    Cd = C * k
    Cout = w_pointwise.shape[0]
    assert w_depthwise.shape == (Cd, 1, 3, 3)
    assert w_pointwise.shape == (Cout, Cd, 1, 1)
    Wp = W + 2
    out_dtype = x_nchw.dtype
    out_item = jnp.dtype(out_dtype).itemsize

    # Path dispatch: tiny channel counts are pad/DMA bound under the 9x MXU fold.
    small = (C < 32) or (Cout <= 32)
    in_dtype = out_dtype if small else jnp.bfloat16          # bf16 MXU operands on main path
    in_item = jnp.dtype(in_dtype).itemsize

    # Per-grid-step VMEM accounting (double-buffered blocks + in-kernel temporaries),
    # weights counted at their real dtype size; used for strip selection.
    if small:
        w_bytes = 2 * (9 * k * C + k * C * Cout) * 4
        per_row = (2 * Wp * C * in_item                       # input rows, double-buffered
                   + 2 * W * Cout * out_item                  # output rows, double-buffered
                   + W * (C + Cout) * 4)                      # f32 z / accumulator temporaries
    else:
        w_bytes = 2 * 9 * C * Cout * 2                        # bf16 fused weights, x2 buffers
        per_row = (2 * Wp * C * in_item
                   + 2 * W * Cout * out_item
                   + 2 * W * 9 * C * in_item                  # im2col lhs / window slices
                   + W * Cout * 4)                            # f32 matmul accumulator
    fixed = w_bytes + 2 * 2 * Wp * C * in_item                # 2 halo rows, double-buffered

    TH = _choose_tile_h(H, N, per_row, fixed)
    nstrips = -(-H // TH)
    Hp = nstrips * TH
    vmem_limit = int(0.85 * _vmem_capacity_bytes())           # generation-aware scoped limit

    # NCHW -> NHWC, spatial zero-pad, pad H up to a strip multiple, cast, and materialize
    # overlapping (TH+2)-row strips so the BlockSpec DMA delivers each strip's halo directly
    # (no per-step VMEM halo-assembly copy inside the kernel).  XLA fuses these data-movement
    # ops into a single HBM pass.
    x_nhwc = jnp.transpose(x_nchw, (0, 2, 3, 1)).astype(in_dtype)
    x_pad = jnp.pad(x_nhwc, ((0, 0), (1, 1 + (Hp - H)), (1, 1), (0, 0)))
    x_strips = jnp.stack([x_pad[:, i * TH:i * TH + TH + 2] for i in range(nstrips)],
                         axis=1).reshape(N * nstrips, TH + 2, Wp, C)

    wd_r = w_depthwise[:, 0, :, :].reshape(C, k, 3, 3)        # (C, k, 3, 3)
    wp_r = w_pointwise[:, :, 0, 0].reshape(Cout, C, k)        # (Cout, C, k)

    grid = (N, nstrips)
    x_spec = pl.BlockSpec((1, TH + 2, Wp, C), lambda n, i: (n * nstrips + i, 0, 0, 0))
    o_spec = pl.BlockSpec((1, TH, W, Cout), lambda n, i: (n, i, 0, 0))
    cparams = pltpu.CompilerParams(dimension_semantics=("parallel", "parallel"),
                                   vmem_limit_bytes=vmem_limit)

    if small:
        wd_fb = jnp.transpose(wd_r, (2, 3, 1, 0)).reshape(9, k, C).astype(jnp.float32)
        wp_fb = jnp.transpose(wp_r, (2, 1, 0)).astype(jnp.float32)        # (k, C, Cout)
        flops = 2 * N * Hp * W * (9 * k * C + k * C * Cout)
        bytes_accessed = int(x_strips.size * in_item + (wd_fb.size + wp_fb.size) * 4
                             + N * Hp * W * Cout * out_item)
        out_full = pl.pallas_call(
            _dwsep_small_kernel,
            out_shape=jax.ShapeDtypeStruct((N, Hp, W, Cout), out_dtype),
            grid_spec=pltpu.PrefetchScalarGridSpec(
                num_scalar_prefetch=0,
                grid=grid,
                in_specs=[x_spec,
                          pl.BlockSpec((9, k, C), lambda n, i: (0, 0, 0)),
                          pl.BlockSpec((k, C, Cout), lambda n, i: (0, 0, 0))],
                out_specs=o_spec),
            compiler_params=cparams,
            cost_estimate=pl.CostEstimate(flops=flops, transcendentals=0,
                                          bytes_accessed=bytes_accessed),
        )(x_strips, wd_fb, wp_fb)
    else:
        # Fold depthwise + pointwise (+ channel multiplier k) into one (9, C, Cout) tensor:
        #   wf[dh*3+dw, c, o] = sum_j wd[c*k+j, 0, dh, dw] * wp[o, c*k+j]
        # Tap-major / channel-minor K ordering matches the im2col built inside the kernel.
        wf = jnp.einsum("cjhw,ocj->hwco", wd_r, wp_r).reshape(9, C, Cout).astype(jnp.bfloat16)
        flops = 2 * N * Hp * W * 9 * C * Cout
        bytes_accessed = int(x_strips.size * in_item + wf.size * 2
                             + N * Hp * W * Cout * out_item)
        out_full = pl.pallas_call(
            _dwsep_mxu_kernel,
            out_shape=jax.ShapeDtypeStruct((N, Hp, W, Cout), out_dtype),
            grid_spec=pltpu.PrefetchScalarGridSpec(
                num_scalar_prefetch=0,
                grid=grid,
                in_specs=[x_spec,
                          pl.BlockSpec((9, C, Cout), lambda n, i: (0, 0, 0))],
                out_specs=o_spec),
            compiler_params=cparams,
            cost_estimate=pl.CostEstimate(flops=flops, transcendentals=0,
                                          bytes_accessed=bytes_accessed),
        )(x_strips, wf)

    out = out_full if Hp == H else out_full[:, :H]
    # TODO(synk): bandwidth-critical consumers should take the NHWC output directly and skip
    # this final transpose back to the module's NCHW layout.
    return jnp.transpose(out, (0, 3, 1, 2))


# ---------------------------------------------------------------------------
# Reference + test
# ---------------------------------------------------------------------------

def _reference(x_nchw, w_depthwise, w_pointwise):
    C = x_nchw.shape[1]
    dn = ("NCHW", "OIHW", "NCHW")
    z = lax.conv_general_dilated(x_nchw, w_depthwise, (1, 1), ((1, 1), (1, 1)),
                                 dimension_numbers=dn, feature_group_count=C)
    return lax.conv_general_dilated(z, w_pointwise, (1, 1), ((0, 0), (0, 0)),
                                    dimension_numbers=dn)


if __name__ == "__main__":
    def run_case(seed_key, N, C, H, W, k, Cout, tol):
        kx, kd, kp = jax.random.split(seed_key, 3)
        Cd = C * k
        x = jax.random.normal(kx, (N, C, H, W), dtype=jnp.float32)
        wd = jax.random.normal(kd, (Cd, 1, 3, 3), dtype=jnp.float32) * 0.1
        wp = jax.random.normal(kp, (Cout, Cd, 1, 1), dtype=jnp.float32) * 0.1
        out = jax.block_until_ready(depthwise_separable_conv2d(x, wd, wp, k=k))
        ref = _reference(x, wd, wp)
        assert out.shape == (N, Cout, H, W)
        assert jnp.allclose(out, ref, atol=tol, rtol=tol), \
            f"mismatch vs reference conv (C={C}, k={k}, Cout={Cout})"

    key = jax.random.PRNGKey(0)
    k1, k2, k3, k4 = jax.random.split(key, 4)
    # Module-default small shapes -> small-channel VPU+matmul path (f32, tight tolerance).
    run_case(k1, N=2, C=4, H=16, W=16, k=1, Cout=8, tol=1e-3)
    # N=1 forces >=2 H-strips (halo across strip boundary) and exercises k=2.
    run_case(k2, N=1, C=4, H=16, W=16, k=2, Cout=8, tol=1e-3)
    # MXU path, unaligned C -> 9 accumulating bf16 matmuls; H=24 exercises H padding.
    run_case(k3, N=2, C=32, H=24, W=16, k=1, Cout=64, tol=3e-2)
    # MXU path, lane-aligned C -> single im2col matmul (K = 9*C), multi-strip with N=1.
    run_case(k4, N=1, C=128, H=16, W=16, k=1, Cout=64, tol=3e-2)
    print("KERNEL_OK")
</pallas_src>

<mosaic_0001>
module attributes {stable_mosaic.version = 11 : i64} {
  func.func @_dwsep_small_kernel(%arg0: i32, %arg1: i32, %arg2: memref<1x18x18x4xf32, #tpu.memory_space<vmem>>, %arg3: memref<9x1x4xf32, #tpu.memory_space<vmem>>, %arg4: memref<1x4x8xf32, #tpu.memory_space<vmem>>, %arg5: memref<1x16x16x8xf32, #tpu.memory_space<vmem>>) attributes {dimension_semantics = [#tpu.dimension_semantics<parallel>, #tpu.dimension_semantics<parallel>], iteration_bounds = array<i64: 2, 1>, scalar_prefetch = 0 : i64, scratch_operands = 0 : i64, tpu.core_type = #tpu.core_type<tc>, window_params = [{transform_indices = @transform_0, window_bounds = array<i64: 1, 18, 18, 4>}, {pipeline_mode = #tpu.pipeline_mode<synchronous>, transform_indices = @transform_1, window_bounds = array<i64: 9, 1, 4>}, {pipeline_mode = #tpu.pipeline_mode<synchronous>, transform_indices = @transform_2, window_bounds = array<i64: 1, 4, 8>}, {transform_indices = @transform_3, window_bounds = array<i64: 1, 16, 16, 8>}]} {
    %cst = arith.constant 0.000000e+00 : f32
    %0 = vector.broadcast %cst : f32 to vector<256x8xf32>
    %cst_0 = arith.constant 0.000000e+00 : f32
    %1 = vector.broadcast %cst_0 : f32 to vector<16x16x4xf32>
    %c0 = arith.constant 0 : index
    %c0_1 = arith.constant 0 : index
    %c0_2 = arith.constant 0 : index
    %2 = vector.load %arg3[%c0, %c0_1, %c0_2] : memref<9x1x4xf32, #tpu.memory_space<vmem>>, vector<1x1x4xf32>
    %3 = vector.shape_cast %2 : vector<1x1x4xf32> to vector<1x4xf32>
    %c0_3 = arith.constant 0 : index
    %c0_4 = arith.constant 0 : index
    %c0_5 = arith.constant 0 : index
    %c0_6 = arith.constant 0 : index
    %4 = vector.load %arg2[%c0_3, %c0_4, %c0_5, %c0_6] : memref<1x18x18x4xf32, #tpu.memory_space<vmem>>, vector<1x16x16x4xf32>
    %5 = vector.shape_cast %4 : vector<1x16x16x4xf32> to vector<16x16x4xf32>
    %6 = vector.shape_cast %3 : vector<1x4xf32> to vector<1x1x4xf32>
    %7 = vector.broadcast %6 : vector<1x1x4xf32> to vector<16x16x4xf32>
    %8 = arith.mulf %5, %7 : vector<16x16x4xf32>
    %9 = arith.addf %1, %8 : vector<16x16x4xf32>
    %c1 = arith.constant 1 : index
    %c0_7 = arith.constant 0 : index
    %c0_8 = arith.constant 0 : index
    %10 = vector.load %arg3[%c1, %c0_7, %c0_8] : memref<9x1x4xf32, #tpu.memory_space<vmem>>, vector<1x1x4xf32>
    %11 = vector.shape_cast %10 : vector<1x1x4xf32> to vector<1x4xf32>
    %c0_9 = arith.constant 0 : index
    %c0_10 = arith.constant 0 : index
    %c1_11 = arith.constant 1 : index
    %c0_12 = arith.constant 0 : index
    %12 = vector.load %arg2[%c0_9, %c0_10, %c1_11, %c0_12] : memref<1x18x18x4xf32, #tpu.memory_space<vmem>>, vector<1x16x16x4xf32>
    %13 = vector.shape_cast %12 : vector<1x16x16x4xf32> to vector<16x16x4xf32>
    %14 = vector.shape_cast %11 : vector<1x4xf32> to vector<1x1x4xf32>
    %15 = vector.broadcast %14 : vector<1x1x4xf32> to vector<16x16x4xf32>
    %16 = arith.mulf %13, %15 : vector<16x16x4xf32>
    %17 = arith.addf %9, %16 : vector<16x16x4xf32>
    %c2 = arith.constant 2 : index
    %c0_13 = arith.constant 0 : index
    %c0_14 = arith.constant 0 : index
    %18 = vector.load %arg3[%c2, %c0_13, %c0_14] : memref<9x1x4xf32, #tpu.memory_space<vmem>>, vector<1x1x4xf32>
    %19 = vector.shape_cast %18 : vector<1x1x4xf32> to vector<1x4xf32>
    %c0_15 = arith.constant 0 : index
    %c0_16 = arith.constant 0 : index
    %c2_17 = arith.constant 2 : index
    %c0_18 = arith.constant 0 : index
    %20 = vector.load %arg2[%c0_15, %c0_16, %c2_17, %c0_18] : memref<1x18x18x4xf32, #tpu.memory_space<vmem>>, vector<1x16x16x4xf32>
    %21 = vector.shape_cast %20 : vector<1x16x16x4xf32> to vector<16x16x4xf32>
    %22 = vector.shape_cast %19 : vector<1x4xf32> to vector<1x1x4xf32>
    %23 = vector.broadcast %22 : vector<1x1x4xf32> to vector<16x16x4xf32>
    %24 = arith.mulf %21, %23 : vector<16x16x4xf32>
    %25 = arith.addf %17, %24 : vector<16x16x4xf32>
    %c3 = arith.constant 3 : index
    %c0_19 = arith.constant 0 : index
    %c0_20 = arith.constant 0 : index
    %26 = vector.load %arg3[%c3, %c0_19, %c0_20] : memref<9x1x4xf32, #tpu.memory_space<vmem>>, vector<1x1x4xf32>
    %27 = vector.shape_cast %26 : vector<1x1x4xf32> to vector<1x4xf32>
    %c0_21 = arith.constant 0 : index
    %c1_22 = arith.constant 1 : index
    %c0_23 = arith.constant 0 : index
    %c0_24 = arith.constant 0 : index
    %28 = vector.load %arg2[%c0_21, %c1_22, %c0_23, %c0_24] : memref<1x18x18x4xf32, #tpu.memory_space<vmem>>, vector<1x16x16x4xf32>
    %29 = vector.shape_cast %28 : vector<1x16x16x4xf32> to vector<16x16x4xf32>
    %30 = vector.shape_cast %27 : vector<1x4xf32> to vector<1x1x4xf32>
    %31 = vector.broadcast %30 : vector<1x1x4xf32> to vector<16x16x4xf32>
    %32 = arith.mulf %29, %31 : vector<16x16x4xf32>
    %33 = arith.addf %25, %32 : vector<16x16x4xf32>
    %c4 = arith.constant 4 : index
    %c0_25 = arith.constant 0 : index
    %c0_26 = arith.constant 0 : index
    %34 = vector.load %arg3[%c4, %c0_25, %c0_26] : memref<9x1x4xf32, #tpu.memory_space<vmem>>, vector<1x1x4xf32>
    %35 = vector.shape_cast %34 : vector<1x1x4xf32> to vector<1x4xf32>
    %c0_27 = arith.constant 0 : index
    %c1_28 = arith.constant 1 : index
    %c1_29 = arith.constant 1 : index
    %c0_30 = arith.constant 0 : index
    %36 = vector.load %arg2[%c0_27, %c1_28, %c1_29, %c0_30] : memref<1x18x18x4xf32, #tpu.memory_space<vmem>>, vector<1x16x16x4xf32>
    %37 = vector.shape_cast %36 : vector<1x16x16x4xf32> to vector<16x16x4xf32>
    %38 = vector.shape_cast %35 : vector<1x4xf32> to vector<1x1x4xf32>
    %39 = vector.broadcast %38 : vector<1x1x4xf32> to vector<16x16x4xf32>
    %40 = arith.mulf %37, %39 : vector<16x16x4xf32>
    %41 = arith.addf %33, %40 : vector<16x16x4xf32>
    %c5 = arith.constant 5 : index
    %c0_31 = arith.constant 0 : index
    %c0_32 = arith.constant 0 : index
    %42 = vector.load %arg3[%c5, %c0_31, %c0_32] : memref<9x1x4xf32, #tpu.memory_space<vmem>>, vector<1x1x4xf32>
    %43 = vector.shape_cast %42 : vector<1x1x4xf32> to vector<1x4xf32>
    %c0_33 = arith.constant 0 : index
    %c1_34 = arith.constant 1 : index
    %c2_35 = arith.constant 2 : index
    %c0_36 = arith.constant 0 : index
    %44 = vector.load %arg2[%c0_33, %c1_34, %c2_35, %c0_36] : memref<1x18x18x4xf32, #tpu.memory_space<vmem>>, vector<1x16x16x4xf32>
    %45 = vector.shape_cast %44 : vector<1x16x16x4xf32> to vector<16x16x4xf32>
    %46 = vector.shape_cast %43 : vector<1x4xf32> to vector<1x1x4xf32>
    %47 = vector.broadcast %46 : vector<1x1x4xf32> to vector<16x16x4xf32>
    %48 = arith.mulf %45, %47 : vector<16x16x4xf32>
    %49 = arith.addf %41, %48 : vector<16x16x4xf32>
    %c6 = arith.constant 6 : index
    %c0_37 = arith.constant 0 : index
    %c0_38 = arith.constant 0 : index
    %50 = vector.load %arg3[%c6, %c0_37, %c0_38] : memref<9x1x4xf32, #tpu.memory_space<vmem>>, vector<1x1x4xf32>
    %51 = vector.shape_cast %50 : vector<1x1x4xf32> to vector<1x4xf32>
    %c0_39 = arith.constant 0 : index
    %c2_40 = arith.constant 2 : index
    %c0_41 = arith.constant 0 : index
    %c0_42 = arith.constant 0 : index
    %52 = vector.load %arg2[%c0_39, %c2_40, %c0_41, %c0_42] : memref<1x18x18x4xf32, #tpu.memory_space<vmem>>, vector<1x16x16x4xf32>
    %53 = vector.shape_cast %52 : vector<1x16x16x4xf32> to vector<16x16x4xf32>
    %54 = vector.shape_cast %51 : vector<1x4xf32> to vector<1x1x4xf32>
    %55 = vector.broadcast %54 : vector<1x1x4xf32> to vector<16x16x4xf32>
    %56 = arith.mulf %53, %55 : vector<16x16x4xf32>
    %57 = arith.addf %49, %56 : vector<16x16x4xf32>
    %c7 = arith.constant 7 : index
    %c0_43 = arith.constant 0 : index
    %c0_44 = arith.constant 0 : index
    %58 = vector.load %arg3[%c7, %c0_43, %c0_44] : memref<9x1x4xf32, #tpu.memory_space<vmem>>, vector<1x1x4xf32>
    %59 = vector.shape_cast %58 : vector<1x1x4xf32> to vector<1x4xf32>
    %c0_45 = arith.constant 0 : index
    %c2_46 = arith.constant 2 : index
    %c1_47 = arith.constant 1 : index
    %c0_48 = arith.constant 0 : index
    %60 = vector.load %arg2[%c0_45, %c2_46, %c1_47, %c0_48] : memref<1x18x18x4xf32, #tpu.memory_space<vmem>>, vector<1x16x16x4xf32>
    %61 = vector.shape_cast %60 : vector<1x16x16x4xf32> to vector<16x16x4xf32>
    %62 = vector.shape_cast %59 : vector<1x4xf32> to vector<1x1x4xf32>
    %63 = vector.broadcast %62 : vector<1x1x4xf32> to vector<16x16x4xf32>
    %64 = arith.mulf %61, %63 : vector<16x16x4xf32>
    %65 = arith.addf %57, %64 : vector<16x16x4xf32>
    %c8 = arith.constant 8 : index
    %c0_49 = arith.constant 0 : index
    %c0_50 = arith.constant 0 : index
    %66 = vector.load %arg3[%c8, %c0_49, %c0_50] : memref<9x1x4xf32, #tpu.memory_space<vmem>>, vector<1x1x4xf32>
    %67 = vector.shape_cast %66 : vector<1x1x4xf32> to vector<1x4xf32>
    %c0_51 = arith.constant 0 : index
    %c2_52 = arith.constant 2 : index
    %c2_53 = arith.constant 2 : index
    %c0_54 = arith.constant 0 : index
    %68 = vector.load %arg2[%c0_51, %c2_52, %c2_53, %c0_54] : memref<1x18x18x4xf32, #tpu.memory_space<vmem>>, vector<1x16x16x4xf32>
    %69 = vector.shape_cast %68 : vector<1x16x16x4xf32> to vector<16x16x4xf32>
    %70 = vector.shape_cast %67 : vector<1x4xf32> to vector<1x1x4xf32>
    %71 = vector.broadcast %70 : vector<1x1x4xf32> to vector<16x16x4xf32>
    %72 = arith.mulf %69, %71 : vector<16x16x4xf32>
    %73 = arith.addf %65, %72 : vector<16x16x4xf32>
    %74 = vector.shape_cast %73 : vector<16x16x4xf32> to vector<256x4xf32>
    %c0_55 = arith.constant 0 : index
    %c0_56 = arith.constant 0 : index
    %c0_57 = arith.constant 0 : index
    %75 = vector.load %arg4[%c0_55, %c0_56, %c0_57] : memref<1x4x8xf32, #tpu.memory_space<vmem>>, vector<1x4x8xf32>
    %76 = vector.shape_cast %75 : vector<1x4x8xf32> to vector<4x8xf32>
    %cst_58 = arith.constant dense<0.000000e+00> : vector<256x8xf32>
    %77 = tpu.matmul %74, %76, %cst_58 {dimension_numbers = #tpu.dot_dimension_numbers<[1], [0], [0], [1], [0, 0, 1, 1], [], []>} : vector<256x4xf32>, vector<4x8xf32>, vector<256x8xf32> -> vector<256x8xf32>
    %78 = arith.addf %0, %77 : vector<256x8xf32>
    %79 = vector.shape_cast %78 : vector<256x8xf32> to vector<16x16x8xf32>
    %c0_59 = arith.constant 0 : index
    %c0_60 = arith.constant 0 : index
    %c0_61 = arith.constant 0 : index
    %c0_62 = arith.constant 0 : index
    %80 = vector.load %arg5[%c0_59, %c0_60, %c0_61, %c0_62] : memref<1x16x16x8xf32, #tpu.memory_space<vmem>>, vector<1x16x16x8xf32>
    %81 = vector.shape_cast %80 : vector<1x16x16x8xf32> to vector<16x16x8xf32>
    %82 = vector.shape_cast %79 : vector<16x16x8xf32> to vector<1x16x16x8xf32>
    tpu.vector_store %arg5[%c0_59, %c0_60, %c0_61, %c0_62], %82 {strides = array<i32>} : memref<1x16x16x8xf32, #tpu.memory_space<vmem>>, vector<1x16x16x8xf32>,
    return
  }
  func.func @transform_0(%arg0: i32, %arg1: i32) -> (i32, i32, i32, i32) {
    %c1_i32 = arith.constant 1 : i32
    %0 = arith.muli %arg0, %c1_i32 : i32
    %1 = arith.addi %0, %arg1 : i32
    %c0_i32 = arith.constant 0 : i32
    %c0_i32_0 = arith.constant 0 : i32
    %c0_i32_1 = arith.constant 0 : i32
    %c0_i32_2 = arith.constant 0 : i32
    return %1, %c0_i32, %c0_i32_0, %c0_i32_1 : i32, i32, i32, i32
  }
  func.func @transform_1(%arg0: i32, %arg1: i32) -> (i32, i32, i32) {
    %c0_i32 = arith.constant 0 : i32
    %c0_i32_0 = arith.constant 0 : i32
    %c0_i32_1 = arith.constant 0 : i32
    %c0_i32_2 = arith.constant 0 : i32
    return %c0_i32, %c0_i32_0, %c0_i32_1 : i32, i32, i32
  }
  func.func @transform_2(%arg0: i32, %arg1: i32) -> (i32, i32, i32) {
    %c0_i32 = arith.constant 0 : i32
    %c0_i32_0 = arith.constant 0 : i32
    %c0_i32_1 = arith.constant 0 : i32
    %c0_i32_2 = arith.constant 0 : i32
    return %c0_i32, %c0_i32_0, %c0_i32_1 : i32, i32, i32
  }
  func.func @transform_3(%arg0: i32, %arg1: i32) -> (i32, i32, i32, i32) {
    %c0_i32 = arith.constant 0 : i32
    %c0_i32_0 = arith.constant 0 : i32
    %c0_i32_1 = arith.constant 0 : i32
    return %arg0, %arg1, %c0_i32, %c0_i32_0 : i32, i32, i32, i32
  }
}

</mosaic_0001>

<bundles_post_ra>
// kernel: tpu_custom_call.1
= control target key start
LH: loop header
LB: loop body
LE: loop exit
PB: predicated region body
PF: predicated region fallthrough
CT: control target
= control target key end

     0   :  { %s2003_s12 = smov 0   ;;  %s2005_s13 = smov 0   ;;  %s3080_s0 = inlined_call_operand.vmem [shape: f32[2,18,18,4], index: 0, kind: input, shape index: {}]   ;;  %s3081_s1 = inlined_call_operand.vmem [shape: f32[9,1,4], index: 1, kind: input, shape index: {}]   ;;  %s3082_s2 = inlined_call_operand.vmem [shape: f32[1,4,8], index: 2, kind: input, shape index: {}]   ;;  %s3083_s3 = inlined_call_operand.vmem [shape: f32[2,16,16,8], index: 3, kind: output, shape index: {}]  }
   0x1   :  { %s2007_s14 = smov 0  }
   0x2 LB: > { %s25_s15 = sadd.s32 1, %s1977_s13  ;;  %p1591_p0 = scmp.ge.s32.totalorder %s1981_s14, 1  ;;  %s1981_s14 = sphi %s2007_s14, %s13_s14   ;;  %s1977_s13 = sphi %s2005_s13, %s3085_s13   ;;  %s1973_s12 = sphi %s2003_s12, %s3084_s12  }
   0x3   : > { %p27_p1 = scmp.ge.s32.totalorder %s25_s15, 2  ;;  %p155_p2 = scmp.lt.s32.totalorder %s1981_s14, 3 }
   0x5   : > { %s3087_s15 = smov (%p27_p1, %s25_s15), 0  ;;  %p156_p3 = pnand %p1591_p0, %p155_p2 }
   0x6   : > { %v1140_v0 = vld [vmem:[%s3082_s2] sm:$0xf] (!%p156_p3)  ;;  %vm1238_vm0 = vcmask (!%p156_p3), 1043456   ;;  %p186_p4 = scmp.lt.s32.totalorder (!%p156_p3), %s1973_s12, 1  ;;  %v2055_v5 = vld [vmem:[%s3081_s1 + $0x4] ss:$0 sm:$0xff] (!%p156_p3) }
   0x7   : > { %159 = sbr.rel (%p156_p3) target bundleno = 378 (0x17a), region = 32  ;;  %1873 = vmatprep.subr.msk.mxu0 (!%p156_p3), %vm1238_vm0, %v1140_v0  ;;  %1923 = vmatprep.subr.msk.mxu1 (!%p156_p3), %vm1238_vm0, %v1140_v0  ;;  %v2030_v1 = vld [vmem:[%s3081_s1] ss:$0 sm:$0xff] (!%p156_p3)  ;;  %v2035_v2 = vld [vmem:[%s3081_s1 + $0x1] ss:$0 sm:$0xff] (!%p156_p3)  ;;  %vm1141_vm1 = vcmask (!%p156_p3), 31744  }
   0x8   : > { %1874 = vmatpush3.msk.msra.mxu0 (!%p156_p3), %vm1238_vm0, %v1140_v0  ;;  %1924 = vmatpush3.msk.msra.mxu1 (!%p156_p3), %vm1238_vm0, %v1140_v0  ;;  %v2040_v3 = vld [vmem:[%s3081_s1 + $0x2] ss:$0 sm:$0xff] (!%p156_p3)  ;;  %v2050_v4 = vld [vmem:[%s3081_s1 + $0x3] ss:$0 sm:$0xff] (!%p156_p3)  ;;  %v2060_v6 = vld [vmem:[%s3081_s1 + $0x5] ss:$0 sm:$0xff] (!%p156_p3) }
   0x9   : > { %v2068_v10 = vld [vmem:[%s3081_s1 + $0x6] ss:$0 sm:$0xff] (!%p156_p3)  ;;  %v2077_v15 = vld [vmem:[%s3081_s1 + $0x7] ss:$0 sm:$0xff] (!%p156_p3)  ;;  %v2082_v16 = vld [vmem:[%s3081_s1 + $0x8] ss:$0 sm:$0xff] (!%p156_p3) }
   0xa   : > { %vm1467_vm2 = vcmask (!%p156_p3), 64512  }
   0xe   : > { %s3089_s12 = smov (!%p186_p4, %s1973_s12), 1 }
   0xf   : > { %s1925_s18 = smul.u32 432, %s3089_s12  ;;  %s1839_s9 = sshll.u32 %s3089_s12, 8 }
  0x10   : > { %s3005_s16 = scalar_lea.vmem %s3083_s3, %s1839_s9 }
  0x11   : > { %s2045_s27 = scalar_lea.vmem %s3080_s0, %s1925_s18 }
  0x12   : > { %v204_v7 = vld [vmem:[%s2045_s27] sm:$0xff]  ;;  %v1601_v14 = vld [vmem:[%s2045_s27 + $0x18] sm:$0xff]  ;;  %v2089_v19 = vld [vmem:[%s2045_s27 + $0x30] sm:$0xff] }
  0x13   : > { %v308_v8 = vld [vmem:[%s2045_s27 + $0x1] sm:$0xff]  ;;  %v242_v11 = vmul.f32 %v2030_v1, %v204_v7  ;;  %v1635_v17 = vld [vmem:[%s2045_s27 + $0x19] sm:$0xff]  ;;  %v555_v21 = vmul.f32 %v2050_v4, %v1601_v14  ;;  %v2099_v27 = vld [vmem:[%s2045_s27 + $0x31] sm:$0xff]  ;;  %v244_v33 = vmul.f32 %v1601_v14, %v2030_v1  ;;  %v868_v35 = vmul.f32 %v2068_v10, %v2089_v19 }
  0x14   : > { %v412_v9 = vld [vmem:[%s2045_s27 + $0x2] sm:$0xff]  ;;  %v346_v12 = vmul.f32 %v2035_v2, %v308_v8  ;;  %v2086_v18 = vld [vmem:[%s2045_s27 + $0x1a] sm:$0xff]  ;;  %v659_v22 = vmul.f32 %v2055_v5, %v1635_v17  ;;  %v2102_v28 = vld [vmem:[%s2045_s27 + $0x32] sm:$0xff]  ;;  %v972_v36 = vmul.f32 %v2077_v15, %v2099_v27  ;;  %v348_v46 = vmul.f32 %v1635_v17, %v2035_v2 }
  0x15   : > { %v450_v13 = vmul.f32 %v2040_v3, %v412_v9  ;;  %v763_v23 = vmul.f32 %v2060_v6, %v2086_v18  ;;  %v220_v24 = vld [vmem:[%s2045_s27 + $0xc0] sm:$0xff]  ;;  %v2108_v32 = vld [vmem:[%s2045_s27 + $0xd8] sm:$0xff]  ;;  %v2117_v37 = vmul.f32 %v2082_v16, %v2102_v28  ;;  %v205_v43 = vld [vmem:[%s2045_s27 + $0x8] sm:$0xff] }
  0x16   : > { %v378_v20 = vadd.f32 %v346_v12, %v242_v11  ;;  %v324_v25 = vld [vmem:[%s2045_s27 + $0xc1] sm:$0xff]  ;;  %v258_v29 = vmul.f32 %v2030_v1, %v220_v24  ;;  %v2120_v38 = vld [vmem:[%s2045_s27 + $0xd9] sm:$0xff]  ;;  %v571_v41 = vmul.f32 %v2050_v4, %v2108_v32  ;;  %v309_v44 = vld [vmem:[%s2045_s27 + $0x9] sm:$0xff]  ;;  %v243_v50 = vmul.f32 %v2030_v1, %v205_v43 }
  0x17   : > { %v428_v26 = vld [vmem:[%s2045_s27 + $0xc2] sm:$0xff]  ;;  %v362_v30 = vmul.f32 %v2035_v2, %v324_v25  ;;  %v2123_v39 = vld [vmem:[%s2045_s27 + $0xda] sm:$0xff]  ;;  %v675_v42 = vmul.f32 %v2055_v5, %v2120_v38  ;;  %v413_v45 = vld [vmem:[%s2045_s27 + $0xa] sm:$0xff]  ;;  %v347_v51 = vmul.f32 %v2035_v2, %v309_v44 }
  0x18   : > { %v466_v31 = vmul.f32 %v2040_v3, %v428_v26  ;;  %v482_v34 = vadd.f32 %v450_v13, %v378_v20  ;;  %v2134_v48 = vld [vmem:[%s2045_s27 + $0xf0] sm:$0xff]  ;;  %v451_v52 = vmul.f32 %v2040_v3, %v413_v45  ;;  %v2143_v53 = vld [vmem:[%s2045_s27 + $0x20] sm:$0xff]  ;;  %v779_v55 = vmul.f32 %v2060_v6, %v2123_v39  ;;  %v221_v0 = vld [vmem:[%s2045_s27 + $0xc8] sm:$0xff] }
  0x19   : > { %v394_v40 = vadd.f32 %v362_v30, %v258_v29  ;;  %v2137_v49 = vld [vmem:[%s2045_s27 + $0xf1] sm:$0xff]  ;;  %v884_v56 = vmul.f32 %v2068_v10, %v2134_v48  ;;  %v2155_v59 = vld [vmem:[%s2045_s27 + $0x21] sm:$0xff]  ;;  %v379_v62 = vadd.f32 %v347_v51, %v243_v50  ;;  %v556_v63 = vmul.f32 %v2050_v4, %v2143_v53  ;;  %v325_v7 = vld [vmem:[%s2045_s27 + $0xc9] sm:$0xff] }
  0x1a   : > { %v587_v47 = vadd.f32 %v555_v21, %v482_v34  ;;  %v988_v57 = vmul.f32 %v2077_v15, %v2137_v49  ;;  %v2152_v58 = vld [vmem:[%s2045_s27 + $0xf2] sm:$0xff]  ;;  %v429_v8 = vld [vmem:[%s2045_s27 + $0xca] sm:$0xff]  ;;  %v660_v11 = vmul.f32 %v2055_v5, %v2155_v59  ;;  %v2167_v12 = vld [vmem:[%s2045_s27 + $0x22] sm:$0xff]  ;;  %v259_v13 = vmul.f32 %v2030_v1, %v221_v0 }
  0x1b   : > { %v498_v54 = vadd.f32 %v466_v31, %v394_v40  ;;  %v1092_v61 = vmul.f32 %v2082_v16, %v2152_v58  ;;  %v363_v14 = vmul.f32 %v2035_v2, %v325_v7  ;;  %v2172_v17 = vld [vmem:[%s2045_s27 + $0xe0] sm:$0xff]  ;;  %v483_v21 = vadd.f32 %v451_v52, %v379_v62  ;;  %v2177_v24 = vld [vmem:[%s2045_s27 + $0x38] sm:$0xff] }
  0x1c   : > { %v691_v60 = vadd.f32 %v659_v22, %v587_v47  ;;  %v764_v22 = vmul.f32 %v2060_v6, %v2167_v12  ;;  %v467_v25 = vmul.f32 %v2040_v3, %v429_v8  ;;  %v869_v29 = vmul.f32 %v2068_v10, %v2177_v24  ;;  %v2183_v30 = vld [vmem:[%s2045_s27 + $0x39] sm:$0xff]  ;;  %v2195_v44 = vld [vmem:[%s2045_s27 + $0xe1] sm:$0xff] }
  0x1d   : > { %v603_v9 = vadd.f32 %v571_v41, %v498_v54  ;;  %v2186_v31 = vld [vmem:[%s2045_s27 + $0x3a] sm:$0xff]  ;;  %v395_v34 = vadd.f32 %v363_v14, %v259_v13  ;;  %v588_v41 = vadd.f32 %v556_v63, %v483_v21  ;;  %v973_v43 = vmul.f32 %v2077_v15, %v2183_v30  ;;  %v2225_v21 = vld [vmem:[%s2045_s27 + $0x48] sm:$0xff] }
  0x1e   : > { %v795_v20 = vadd.f32 %v763_v23, %v691_v60  ;;  %v572_v23 = vmul.f32 %v2050_v4, %v2172_v17  ;;  %v676_v50 = vmul.f32 %v2055_v5, %v2195_v44  ;;  %v380_v51 = vadd.f32 %v348_v46, %v244_v33  ;;  %v2200_v60 = vld [vmem:[%s2045_s27 + $0xe2] sm:$0xff]  ;;  %v2215_v8 = vld [vmem:[%s2045_s27 + $0xf9] sm:$0xff] }
  0x1f   : > { %v707_v26 = vadd.f32 %v675_v42, %v603_v9  ;;  %v1077_v42 = vmul.f32 %v2082_v16, %v2186_v31  ;;  %v499_v47 = vadd.f32 %v467_v25, %v395_v34  ;;  %v692_v54 = vadd.f32 %v660_v11, %v588_v41 }
  0x20   : > { %v900_v40 = vadd.f32 %v868_v35, %v795_v20  ;;  %v2203_v35 = vld [vmem:[%s2045_s27 + $0xf8] sm:$0xff]  ;;  %v452_v62 = vmul.f32 %v2086_v18, %v2040_v3  ;;  %v557_v63 = vmul.f32 %v2089_v19, %v2050_v4  ;;  %v780_v7 = vmul.f32 %v2060_v6, %v2200_v60 }
  0x21   : > { %v811_v45 = vadd.f32 %v779_v55, %v707_v26  ;;  %v604_v55 = vadd.f32 %v572_v23, %v499_v47  ;;  %v885_v33 = vmul.f32 %v2068_v10, %v2203_v35  ;;  %v796_v46 = vadd.f32 %v764_v22, %v692_v54 }
  0x22   : > { %v1004_v52 = vadd.f32 %v972_v36, %v900_v40  ;;  %v484_v9 = vadd.f32 %v452_v62, %v380_v51  ;;  %v661_v18 = vmul.f32 %v2099_v27, %v2055_v5  ;;  %v989_v13 = vmul.f32 %v2077_v15, %v2215_v8  ;;  %v2251_v62 = vld [vmem:[%s2045_s27 + $0x4a] sm:$0xff] }
  0x23   : > { %v916_v0 = vadd.f32 %v884_v56, %v811_v45  ;;  %v708_v56 = vadd.f32 %v676_v50, %v604_v55  ;;  %v765_v14 = vmul.f32 %v2102_v28, %v2060_v6  ;;  %v260_v22 = vmul.f32 %v2108_v32, %v2030_v1  ;;  %v2239_v45 = vld [vmem:[%s2045_s27 + $0x49] sm:$0xff] }
  0x24   : > { %v1108_v36 = vadd.f32 %v2117_v37, %v1004_v52  ;;  %v901_v37 = vadd.f32 %v869_v29, %v796_v46  ;;  %v589_v20 = vadd.f32 %v557_v63, %v484_v9  ;;  %v870_v34 = vmul.f32 %v2068_v10, %v2225_v21  ;;  %v2236_v29 = vld [vmem:[%s2045_s27 + $0xfa] sm:$0xff] }
  0x25   : > { %v1020_v11 = vadd.f32 %v988_v57, %v916_v0  ;;  %v364_v57 = vmul.f32 %v2120_v38, %v2035_v2  ;;  %v812_v26 = vadd.f32 %v780_v7, %v708_v56  ;;  %v468_v23 = vmul.f32 %v2123_v39, %v2040_v3 }
  0x26   : > { %1875 = vmatprep.mubr.msk.f32.mxu0 %vm1141_vm1, %v1108_v36  ;;  %v1005_v40 = vadd.f32 %v973_v43, %v901_v37  ;;  %v693_v41 = vadd.f32 %v661_v18, %v589_v20  ;;  %v573_v32 = vmul.f32 %v2134_v48, %v2050_v4  ;;  %v974_v39 = vmul.f32 %v2077_v15, %v2239_v45 }
  0x27   : > { %v1124_v25 = vadd.f32 %v1092_v61, %v1020_v11  ;;  %v396_v47 = vadd.f32 %v364_v57, %v260_v22  ;;  %v917_v38 = vadd.f32 %v885_v33, %v812_v26  ;;  %v1093_v61 = vmul.f32 %v2082_v16, %v2236_v29 }
  0x28   : > { %v1109_v43 = vadd.f32 %v1077_v42, %v1005_v40  ;;  %v797_v50 = vadd.f32 %v765_v14, %v693_v41  ;;  %v677_v52 = vmul.f32 %v2137_v49, %v2055_v5  ;;  %v245_v63 = vmul.f32 %v2143_v53, %v2030_v1  ;;  %v2265_v53 = vld [vmem:[%s2045_s27 + $0x108] sm:$0xff]  ;;  %v2293_v41 = vld [vmem:[%s2045_s27 + $0x50] sm:$0xff] }
  0x29   : > { %1899 = vmatprep.mubr.msk.f32.mxu1 %vm1141_vm1, %v1124_v25  ;;  %v500_v51 = vadd.f32 %v468_v23, %v396_v47  ;;  %v1021_v54 = vadd.f32 %v989_v13, %v917_v38  ;;  %v349_v0 = vmul.f32 %v2155_v59, %v2035_v2  ;;  %v453_v55 = vmul.f32 %v2167_v12, %v2040_v3  ;;  %v2275_v13 = vld [vmem:[%s2045_s27 + $0x109] sm:$0xff] }
  0x2a   : > { %1876 = vmatmul.mubr.msk.f32.vlgmr.msra.gmra.mrb[0].mxu0 %vm1141_vm1, %v1109_v43  ;;  %v902_v42 = vadd.f32 %v870_v34, %v797_v50  ;;  %v1078_v7 = vmul.f32 %v2082_v16, %v2251_v62  ;;  %v781_v36 = vmul.f32 %v2152_v58, %v2060_v6  ;;  %v558_v59 = vmul.f32 %v2177_v24, %v2050_v4  ;;  %v2278_v14 = vld [vmem:[%s2045_s27 + $0x10a] sm:$0xff]  ;;  %v2308_v50 = vld [vmem:[%s2045_s27 + $0x52] sm:$0xff] }
  0x2b   : > { %v605_v33 = vadd.f32 %v573_v32, %v500_v51  ;;  %v1125_v46 = vadd.f32 %v1093_v61, %v1021_v54  ;;  %v381_v9 = vadd.f32 %v349_v0, %v245_v63  ;;  %v886_v11 = vmul.f32 %v2068_v10, %v2265_v53  ;;  %v2305_v43 = vld [vmem:[%s2045_s27 + $0x51] sm:$0xff] }
  0x2c   : > { %v1006_v18 = vadd.f32 %v974_v39, %v902_v42  ;;  %v662_v56 = vmul.f32 %v2183_v30, %v2055_v5  ;;  %v261_v20 = vmul.f32 %v2172_v17, %v2030_v1  ;;  %v365_v22 = vmul.f32 %v2195_v44, %v2035_v2 }
  0x2d   : > { %v709_v12 = vadd.f32 %v677_v52, %v605_v33  ;;  %1900 = vmatmul.mubr.msk.f32.vlgmr.msra.gmra.mrb[0].mxu1 %vm1141_vm1, %v1125_v46  ;;  %v485_v37 = vadd.f32 %v453_v55, %v381_v9  ;;  %v469_v57 = vmul.f32 %v2200_v60, %v2040_v3  ;;  %v990_v34 = vmul.f32 %v2077_v15, %v2275_v13  ;;  %v2321_v33 = vld [vmem:[%s2045_s27 + $0x110] sm:$0xff] }
  0x2e   : > { %v1110_v25 = vadd.f32 %v1078_v7, %v1006_v18  ;;  %v1094_v23 = vmul.f32 %v2082_v16, %v2278_v14  ;;  %v766_v17 = vmul.f32 %v2186_v31, %v2060_v6  ;;  %v397_v44 = vadd.f32 %v365_v22, %v261_v20 }
  0x2f   : > { %v813_v26 = vadd.f32 %v781_v36, %v709_v12  ;;  %v590_v40 = vadd.f32 %v558_v59, %v485_v37  ;;  %v574_v60 = vmul.f32 %v2203_v35, %v2050_v4  ;;  %v871_v32 = vmul.f32 %v2068_v10, %v2293_v41 }
  0x30   : > { %1878 = vmatprep.mubr.msk.f32.mxu0 %vm1141_vm1, %v1110_v25  ;;  %v678_v38 = vmul.f32 %v2215_v8, %v2055_v5  ;;  %v246_v61 = vmul.f32 %v2089_v19, %v2030_v1  ;;  %v501_v51 = vadd.f32 %v469_v57, %v397_v44  ;;  %v350_v52 = vmul.f32 %v2099_v27, %v2035_v2 }
  0x31   : > { %v918_v47 = vadd.f32 %v886_v11, %v813_v26  ;;  %v694_v39 = vadd.f32 %v662_v56, %v590_v40  ;;  %v454_v54 = vmul.f32 %v2102_v28, %v2040_v3  ;;  %v975_v0 = vmul.f32 %v2077_v15, %v2305_v43  ;;  %v2332_v11 = vld [vmem:[%s2045_s27 + $0x111] sm:$0xff] }
  0x32   : > { %v1079_v19 = vmul.f32 %v2082_v16, %v2308_v50  ;;  %v782_v55 = vmul.f32 %v2236_v29, %v2060_v6  ;;  %v606_v7 = vadd.f32 %v574_v60, %v501_v51  ;;  %v382_v36 = vadd.f32 %v350_v52, %v246_v61  ;;  %v2360_v61 = vld [vmem:[%s2045_s27 + $0x61] sm:$0xff] }
  0x33   : > { %v1022_v63 = vadd.f32 %v990_v34, %v918_v47  ;;  %v798_v42 = vadd.f32 %v766_v17, %v694_v39  ;;  %v559_v27 = vmul.f32 %v2225_v21, %v2050_v4  ;;  %v887_v46 = vmul.f32 %v2068_v10, %v2321_v33  ;;  %v2346_v34 = vld [vmem:[%s2045_s27 + $0x112] sm:$0xff]  ;;  %v2363_v39 = vld [vmem:[%s2045_s27 + $0x62] sm:$0xff] }
  0x34   : > { %v663_v9 = vmul.f32 %v2239_v45, %v2055_v5  ;;  %v262_v59 = vmul.f32 %v2134_v48, %v2030_v1  ;;  %v710_v12 = vadd.f32 %v678_v38, %v606_v7  ;;  %v486_v56 = vadd.f32 %v454_v54, %v382_v36  ;;  %v2377_v7 = vld [vmem:[%s2045_s27 + $0x120] sm:$0xff] }
  0x35   : > { %v1126_v28 = vadd.f32 %v1094_v23, %v1022_v63  ;;  %v903_v18 = vadd.f32 %v871_v32, %v798_v42  ;;  %v366_v37 = vmul.f32 %v2137_v49, %v2035_v2  ;;  %v991_v20 = vmul.f32 %v2077_v15, %v2332_v11  ;;  %v2349_v23 = vld [vmem:[%s2045_s27 + $0x60] sm:$0xff] }
  0x36   : > { %v767_v22 = vmul.f32 %v2251_v62, %v2060_v6  ;;  %v470_v48 = vmul.f32 %v2152_v58, %v2040_v3  ;;  %v575_v57 = vmul.f32 %v2265_v53, %v2050_v4  ;;  %v814_v26 = vadd.f32 %v782_v55, %v710_v12  ;;  %v2380_v36 = vld [vmem:[%s2045_s27 + $0x121] sm:$0xff] }
  0x37   : > { %1902 = vmatprep.mubr.msk.f32.mxu1 %vm1141_vm1, %v1126_v28  ;;  %v1007_v25 = vadd.f32 %v975_v0, %v903_v18  ;;  %v591_v49 = vadd.f32 %v559_v27, %v486_v56  ;;  %v398_v40 = vadd.f32 %v366_v37, %v262_v59  ;;  %v1095_v17 = vmul.f32 %v2082_v16, %v2346_v34  ;;  %v2391_v12 = vld [vmem:[%s2045_s27 + $0x122] sm:$0xff] }
  0x38   : > { %v872_v44 = vmul.f32 %v2068_v10, %v2349_v23  ;;  %v679_v58 = vmul.f32 %v2275_v13, %v2055_v5  ;;  %v247_v60 = vmul.f32 %v2177_v24, %v2030_v1  ;;  %v919_v32 = vadd.f32 %v887_v46, %v814_v26  ;;  %v2405_v26 = vld [vmem:[%s2045_s27 + $0x68] sm:$0xff] }
  0x39   : > { %v1111_v47 = vadd.f32 %v1079_v19, %v1007_v25  ;;  %v695_v38 = vadd.f32 %v663_v9, %v591_v49  ;;  %v502_v51 = vadd.f32 %v470_v48, %v398_v40  ;;  %v976_v52 = vmul.f32 %v2077_v15, %v2360_v61 }
  0x3a   : > { %v1080_v54 = vmul.f32 %v2082_v16, %v2363_v39  ;;  %v351_v63 = vmul.f32 %v2183_v30, %v2035_v2  ;;  %v455_v24 = vmul.f32 %v2186_v31, %v2040_v3  ;;  %v1023_v0 = vadd.f32 %v991_v20, %v919_v32  ;;  %v2416_v32 = vld [vmem:[%s2045_s27 + $0x69] sm:$0xff] }
  0x3b   : > { %1879 = vmatmul.mubr.msk.f32.gmra.mrb[2].mxu0 %vm1141_vm1, %v1111_v47  ;;  %v799_v19 = vadd.f32 %v767_v22, %v695_v38  ;;  %v607_v55 = vadd.f32 %v575_v57, %v502_v51  ;;  %v783_v42 = vmul.f32 %v2278_v14, %v2060_v6  ;;  %v888_v27 = vmul.f32 %v2068_v10, %v2377_v7  ;;  %v2419_v38 = vld [vmem:[%s2045_s27 + $0x6a] sm:$0xff] }
  0x3c   : > { %v992_v30 = vmul.f32 %v2077_v15, %v2380_v36  ;;  %v383_v31 = vadd.f32 %v351_v63, %v247_v60  ;;  %v560_v28 = vmul.f32 %v2293_v41, %v2050_v4  ;;  %v1127_v46 = vadd.f32 %v1095_v17, %v1023_v0 }
  0x3d   : > { %v904_v9 = vadd.f32 %v872_v44, %v799_v19  ;;  %v711_v59 = vadd.f32 %v679_v58, %v607_v55  ;;  %v263_v18 = vmul.f32 %v2203_v35, %v2030_v1  ;;  %v664_v37 = vmul.f32 %v2305_v43, %v2055_v5 }
  0x3e   : > { %v487_v56 = vadd.f32 %v455_v24, %v383_v31  ;;  %v367_v20 = vmul.f32 %v2215_v8, %v2035_v2  ;;  %v471_v22 = vmul.f32 %v2236_v29, %v2040_v3  ;;  %1903 = vmatmul.mubr.msk.f32.gmra.mrb[2].mxu1 %vm1141_vm1, %v1127_v46  ;;  %v1096_v35 = vmul.f32 %v2082_v16, %v2391_v12 }
  0x3f   : > { %v1008_v48 = vadd.f32 %v976_v52, %v904_v9  ;;  %v815_v57 = vadd.f32 %v783_v42, %v711_v59  ;;  %v768_v25 = vmul.f32 %v2308_v50, %v2060_v6  ;;  %v873_v8 = vmul.f32 %v2068_v10, %v2405_v26  ;;  %v2433_v42 = vld [vmem:[%s2045_s27 + $0x128] sm:$0xff] }
  0x40   : > { %v592_v49 = vadd.f32 %v560_v28, %v487_v56  ;;  %v399_v40 = vadd.f32 %v367_v20, %v263_v18  ;;  %v576_v29 = vmul.f32 %v2321_v33, %v2050_v4  ;;  %v680_v58 = vmul.f32 %v2332_v11, %v2055_v5  ;;  %v2444_v59 = vld [vmem:[%s2045_s27 + $0x129] sm:$0xff] }
  0x41   : > { %v1112_v17 = vadd.f32 %v1080_v54, %v1008_v48  ;;  %v920_v44 = vadd.f32 %v888_v27, %v815_v57  ;;  %v248_v60 = vmul.f32 %v2225_v21, %v2030_v1  ;;  %v352_v52 = vmul.f32 %v2239_v45, %v2035_v2 }
  0x42   : > { %v696_v47 = vadd.f32 %v664_v37, %v592_v49  ;;  %v503_v51 = vadd.f32 %v471_v22, %v399_v40  ;;  %v456_v54 = vmul.f32 %v2251_v62, %v2040_v3  ;;  %v977_v24 = vmul.f32 %v2077_v15, %v2416_v32 }
  0x43   : > { %1881 = vmatprep.mubr.msk.f32.mxu0 %vm1141_vm1, %v1112_v17  ;;  %v1024_v63 = vadd.f32 %v992_v30, %v920_v44  ;;  %v1081_v21 = vmul.f32 %v2082_v16, %v2419_v38  ;;  %v784_v0 = vmul.f32 %v2346_v34, %v2060_v6  ;;  %v384_v45 = vadd.f32 %v352_v52, %v248_v60  ;;  %v2472_v60 = vld [vmem:[%s2045_s27 + $0x79] sm:$0xff] }
  0x44   : > { %v800_v19 = vadd.f32 %v768_v25, %v696_v47  ;;  %v608_v55 = vadd.f32 %v576_v29, %v503_v51  ;;  %v561_v62 = vmul.f32 %v2349_v23, %v2050_v4  ;;  %v889_v30 = vmul.f32 %v2068_v10, %v2433_v42  ;;  %v2461_v25 = vld [vmem:[%s2045_s27 + $0x78] sm:$0xff] }
  0x45   : > { %v1128_v27 = vadd.f32 %v1096_v35, %v1024_v63  ;;  %v665_v31 = vmul.f32 %v2360_v61, %v2055_v5  ;;  %v264_v28 = vmul.f32 %v2265_v53, %v2030_v1  ;;  %v488_v18 = vadd.f32 %v456_v54, %v384_v45  ;;  %v2458_v35 = vld [vmem:[%s2045_s27 + $0x12a] sm:$0xff]  ;;  %v2475_v47 = vld [vmem:[%s2045_s27 + $0x7a] sm:$0xff] }
  0x46   : > { %v905_v46 = vadd.f32 %v873_v8, %v800_v19  ;;  %v712_v9 = vadd.f32 %v680_v58, %v608_v55  ;;  %v368_v56 = vmul.f32 %v2275_v13, %v2035_v2  ;;  %v993_v37 = vmul.f32 %v2077_v15, %v2444_v59  ;;  %v2489_v55 = vld [vmem:[%s2045_s27 + $0x138] sm:$0xff] }
  0x47   : > { %1905 = vmatprep.mubr.msk.f32.mxu1 %vm1141_vm1, %v1128_v27  ;;  %v769_v20 = vmul.f32 %v2363_v39, %v2060_v6  ;;  %v472_v53 = vmul.f32 %v2278_v14, %v2040_v3  ;;  %v577_v22 = vmul.f32 %v2377_v7, %v2050_v4  ;;  %v593_v13 = vadd.f32 %v561_v62, %v488_v18  ;;  %v2492_v45 = vld [vmem:[%s2045_s27 + $0x139] sm:$0xff] }
  0x48   : > { %v1009_v48 = vadd.f32 %v977_v24, %v905_v46  ;;  %v816_v57 = vadd.f32 %v784_v0, %v712_v9  ;;  %v400_v49 = vadd.f32 %v368_v56, %v264_v28  ;;  %v1097_v8 = vmul.f32 %v2082_v16, %v2458_v35  ;;  %v2503_v9 = vld [vmem:[%s2045_s27 + $0x13a] sm:$0xff] }
  0x49   : > { %v874_v40 = vmul.f32 %v2068_v10, %v2461_v25  ;;  %v681_v14 = vmul.f32 %v2380_v36, %v2055_v5  ;;  %v249_v29 = vmul.f32 %v2293_v41, %v2030_v1  ;;  %v697_v58 = vadd.f32 %v665_v31, %v593_v13 }
  0x4a   : > { %v1113_v17 = vadd.f32 %v1081_v21, %v1009_v48  ;;  %v921_v44 = vadd.f32 %v889_v30, %v816_v57  ;;  %v504_v51 = vadd.f32 %v472_v53, %v400_v49  ;;  %v978_v52 = vmul.f32 %v2077_v15, %v2472_v60  ;;  %v2517_v57 = vld [vmem:[%s2045_s27 + $0x80] sm:$0xff] }
  0x4b   : > { %v1082_v54 = vmul.f32 %v2082_v16, %v2475_v47  ;;  %v353_v63 = vmul.f32 %v2305_v43, %v2035_v2  ;;  %v457_v41 = vmul.f32 %v2308_v50, %v2040_v3  ;;  %v801_v21 = vadd.f32 %v769_v20, %v697_v58  ;;  %v2531_v58 = vld [vmem:[%s2045_s27 + $0x82] sm:$0xff] }
  0x4c   : > { %1882 = vmatmul.mubr.msk.f32.gmra.mrb[4].mxu0 %vm1141_vm1, %v1113_v17  ;;  %v1025_v24 = vadd.f32 %v993_v37, %v921_v44  ;;  %v609_v0 = vadd.f32 %v577_v22, %v504_v51  ;;  %v785_v19 = vmul.f32 %v2391_v12, %v2060_v6  ;;  %v890_v62 = vmul.f32 %v2068_v10, %v2489_v55  ;;  %v2528_v44 = vld [vmem:[%s2045_s27 + $0x81] sm:$0xff] }
  0x4d   : > { %v994_v43 = vmul.f32 %v2077_v15, %v2492_v45  ;;  %v385_v50 = vadd.f32 %v353_v63, %v249_v29  ;;  %v562_v27 = vmul.f32 %v2405_v26, %v2050_v4  ;;  %v906_v31 = vadd.f32 %v874_v40, %v801_v21 }
  0x4e   : > { %v1129_v30 = vadd.f32 %v1097_v8, %v1025_v24  ;;  %v713_v28 = vadd.f32 %v681_v14, %v609_v0  ;;  %v265_v46 = vmul.f32 %v2321_v33, %v2030_v1  ;;  %v666_v56 = vmul.f32 %v2416_v32, %v2055_v5 }
  0x4f   : > { %v489_v18 = vadd.f32 %v457_v41, %v385_v50  ;;  %v369_v37 = vmul.f32 %v2332_v11, %v2035_v2  ;;  %v473_v20 = vmul.f32 %v2346_v34, %v2040_v3  ;;  %v1010_v53 = vadd.f32 %v978_v52, %v906_v31 }
  0x50   : > { %1906 = vmatmul.mubr.msk.f32.gmra.mrb[4].mxu1 %vm1141_vm1, %v1129_v30  ;;  %v817_v22 = vadd.f32 %v785_v19, %v713_v28  ;;  %v1098_v33 = vmul.f32 %v2082_v16, %v2503_v9  ;;  %v770_v48 = vmul.f32 %v2419_v38, %v2060_v6  ;;  %v875_v11 = vmul.f32 %v2068_v10, %v2517_v57  ;;  %v2545_v19 = vld [vmem:[%s2045_s27 + $0x140] sm:$0xff] }
  0x51   : > { %v594_v13 = vadd.f32 %v562_v27, %v489_v18  ;;  %v401_v49 = vadd.f32 %v369_v37, %v265_v46  ;;  %v578_v34 = vmul.f32 %v2433_v42, %v2050_v4  ;;  %v1114_v8 = vadd.f32 %v1082_v54, %v1010_v53  ;;  %v2556_v28 = vld [vmem:[%s2045_s27 + $0x141] sm:$0xff] }
  0x52   : > { %v922_v40 = vadd.f32 %v890_v62, %v817_v22  ;;  %v682_v14 = vmul.f32 %v2444_v59, %v2055_v5  ;;  %v250_v29 = vmul.f32 %v2349_v23, %v2030_v1  ;;  %v354_v52 = vmul.f32 %v2360_v61, %v2035_v2 }
  0x53   : > { %v698_v17 = vadd.f32 %v666_v56, %v594_v13  ;;  %v505_v51 = vadd.f32 %v473_v20, %v401_v49  ;;  %v458_v54 = vmul.f32 %v2363_v39, %v2040_v3  ;;  %1884 = vmatprep.mubr.msk.f32.mxu0 %vm1141_vm1, %v1114_v8  ;;  %v979_v41 = vmul.f32 %v2077_v15, %v2528_v44 }
  0x54   : > { %v1026_v63 = vadd.f32 %v994_v43, %v922_v40  ;;  %v1083_v23 = vmul.f32 %v2082_v16, %v2531_v58  ;;  %v786_v24 = vmul.f32 %v2458_v35, %v2060_v6  ;;  %v386_v61 = vadd.f32 %v354_v52, %v250_v29  ;;  %v2584_v29 = vld [vmem:[%s2045_s27 + $0x91] sm:$0xff] }
  0x55   : > { %v802_v21 = vadd.f32 %v770_v48, %v698_v17  ;;  %v610_v0 = vadd.f32 %v578_v34, %v505_v51  ;;  %v563_v39 = vmul.f32 %v2461_v25, %v2050_v4  ;;  %v891_v43 = vmul.f32 %v2068_v10, %v2545_v19  ;;  %v2573_v48 = vld [vmem:[%s2045_s27 + $0x90] sm:$0xff] }
  0x56   : > { %v1130_v62 = vadd.f32 %v1098_v33, %v1026_v63  ;;  %v667_v50 = vmul.f32 %v2472_v60, %v2055_v5  ;;  %v266_v27 = vmul.f32 %v2377_v7, %v2030_v1  ;;  %v490_v46 = vadd.f32 %v458_v54, %v386_v61  ;;  %v2570_v33 = vld [vmem:[%s2045_s27 + $0x142] sm:$0xff]  ;;  %v2587_v17 = vld [vmem:[%s2045_s27 + $0x92] sm:$0xff] }
  0x57   : > { %v907_v30 = vadd.f32 %v875_v11, %v802_v21  ;;  %v714_v31 = vadd.f32 %v682_v14, %v610_v0  ;;  %v370_v18 = vmul.f32 %v2380_v36, %v2035_v2  ;;  %v995_v56 = vmul.f32 %v2077_v15, %v2556_v28  ;;  %v2601_v0 = vld [vmem:[%s2045_s27 + $0x150] sm:$0xff] }
  0x58   : > { %1908 = vmatprep.mubr.msk.f32.mxu1 %vm1141_vm1, %v1130_v62  ;;  %v771_v37 = vmul.f32 %v2475_v47, %v2060_v6  ;;  %v474_v7 = vmul.f32 %v2391_v12, %v2040_v3  ;;  %v579_v20 = vmul.f32 %v2489_v55, %v2050_v4  ;;  %v595_v36 = vadd.f32 %v563_v39, %v490_v46  ;;  %v2604_v61 = vld [vmem:[%s2045_s27 + $0x151] sm:$0xff] }
  0x59   : > { %v1011_v53 = vadd.f32 %v979_v41, %v907_v30  ;;  %v818_v22 = vadd.f32 %v786_v24, %v714_v31  ;;  %v402_v13 = vadd.f32 %v370_v18, %v266_v27  ;;  %v1099_v11 = vmul.f32 %v2082_v16, %v2570_v33  ;;  %v2615_v31 = vld [vmem:[%s2045_s27 + $0x152] sm:$0xff] }
  0x5a   : > { %v876_v49 = vmul.f32 %v2068_v10, %v2573_v48  ;;  %v683_v12 = vmul.f32 %v2492_v45, %v2055_v5  ;;  %v251_v34 = vmul.f32 %v2405_v26, %v2030_v1  ;;  %v699_v14 = vadd.f32 %v667_v50, %v595_v36 }
  0x5b   : > { %v1115_v8 = vadd.f32 %v1083_v23, %v1011_v53  ;;  %v923_v40 = vadd.f32 %v891_v43, %v818_v22  ;;  %v506_v51 = vadd.f32 %v474_v7, %v402_v13  ;;  %v980_v52 = vmul.f32 %v2077_v15, %v2584_v29  ;;  %v2629_v22 = vld [vmem:[%s2045_s27 + $0x98] sm:$0xff] }
  0x5c   : > { %v1084_v54 = vmul.f32 %v2082_v16, %v2587_v17  ;;  %v355_v63 = vmul.f32 %v2416_v32, %v2035_v2  ;;  %v459_v26 = vmul.f32 %v2419_v38, %v2040_v3  ;;  %v803_v23 = vadd.f32 %v771_v37, %v699_v14  ;;  %v2643_v14 = vld [vmem:[%s2045_s27 + $0x9a] sm:$0xff] }
  0x5d   : > { %1885 = vmatmul.mubr.msk.f32.gmra.mrb[6].mxu0 %vm1141_vm1, %v1115_v8  ;;  %v1027_v41 = vadd.f32 %v995_v56, %v923_v40  ;;  %v611_v24 = vadd.f32 %v579_v20, %v506_v51  ;;  %v787_v21 = vmul.f32 %v2503_v9, %v2060_v6  ;;  %v892_v39 = vmul.f32 %v2068_v10, %v2601_v0  ;;  %v2640_v40 = vld [vmem:[%s2045_s27 + $0x99] sm:$0xff] }
  0x5e   : > { %v996_v32 = vmul.f32 %v2077_v15, %v2604_v61  ;;  %v387_v38 = vadd.f32 %v355_v63, %v251_v34  ;;  %v564_v62 = vmul.f32 %v2517_v57, %v2050_v4  ;;  %v908_v50 = vadd.f32 %v876_v49, %v803_v23 }
  0x5f   : > { %v1131_v43 = vadd.f32 %v1099_v11, %v1027_v41  ;;  %v715_v27 = vadd.f32 %v683_v12, %v611_v24  ;;  %v267_v30 = vmul.f32 %v2433_v42, %v2030_v1  ;;  %v668_v18 = vmul.f32 %v2528_v44, %v2055_v5 }
  0x60   : > { %v491_v46 = vadd.f32 %v459_v26, %v387_v38  ;;  %v371_v56 = vmul.f32 %v2444_v59, %v2035_v2  ;;  %v475_v37 = vmul.f32 %v2458_v35, %v2040_v3  ;;  %v1012_v7 = vadd.f32 %v980_v52, %v908_v50 }
  0x61   : > { %1909 = vmatmul.mubr.msk.f32.gmra.mrb[6].mxu1 %vm1141_vm1, %v1131_v43  ;;  %v819_v20 = vadd.f32 %v787_v21, %v715_v27  ;;  %v1100_v42 = vmul.f32 %v2082_v16, %v2615_v31  ;;  %v772_v53 = vmul.f32 %v2531_v58, %v2060_v6  ;;  %v877_v59 = vmul.f32 %v2068_v10, %v2629_v22  ;;  %v2657_v21 = vld [vmem:[%s2045_s27 + $0x158] sm:$0xff] }
  0x62   : > { %v596_v36 = vadd.f32 %v564_v62, %v491_v46  ;;  %v403_v13 = vadd.f32 %v371_v56, %v267_v30  ;;  %v580_v35 = vmul.f32 %v2545_v19, %v2050_v4  ;;  %v1116_v11 = vadd.f32 %v1084_v54, %v1012_v7  ;;  %v2668_v27 = vld [vmem:[%s2045_s27 + $0x159] sm:$0xff] }
  0x63   : > { %v924_v49 = vadd.f32 %v892_v39, %v819_v20  ;;  %v684_v12 = vmul.f32 %v2556_v28, %v2055_v5  ;;  %v252_v34 = vmul.f32 %v2461_v25, %v2030_v1  ;;  %v356_v52 = vmul.f32 %v2472_v60, %v2035_v2 }
  0x64   : > { %v700_v8 = vadd.f32 %v668_v18, %v596_v36  ;;  %v507_v51 = vadd.f32 %v475_v37, %v403_v13  ;;  %v460_v54 = vmul.f32 %v2475_v47, %v2040_v3  ;;  %1887 = vmatprep.mubr.msk.f32.mxu0 %vm1141_vm1, %v1116_v11  ;;  %v981_v26 = vmul.f32 %v2077_v15, %v2640_v40 }
  0x65   : > { %v1028_v63 = vadd.f32 %v996_v32, %v924_v49  ;;  %v1085_v25 = vmul.f32 %v2082_v16, %v2643_v14  ;;  %v788_v41 = vmul.f32 %v2570_v33, %v2060_v6  ;;  %v388_v60 = vadd.f32 %v356_v52, %v252_v34  ;;  %v2696_v34 = vld [vmem:[%s2045_s27 + $0xa9] sm:$0xff] }
  0x66   : > { %v804_v23 = vadd.f32 %v772_v53, %v700_v8  ;;  %v612_v24 = vadd.f32 %v580_v35, %v507_v51  ;;  %v565_v47 = vmul.f32 %v2573_v48, %v2050_v4  ;;  %v893_v32 = vmul.f32 %v2068_v10, %v2657_v21  ;;  %v2685_v53 = vld [vmem:[%s2045_s27 + $0xa8] sm:$0xff] }
  0x67   : > { %v1132_v39 = vadd.f32 %v1100_v42, %v1028_v63  ;;  %v669_v38 = vmul.f32 %v2584_v29, %v2055_v5  ;;  %v268_v62 = vmul.f32 %v2489_v55, %v2030_v1  ;;  %v492_v30 = vadd.f32 %v460_v54, %v388_v60  ;;  %v2682_v42 = vld [vmem:[%s2045_s27 + $0x15a] sm:$0xff]  ;;  %v2699_v8 = vld [vmem:[%s2045_s27 + $0xaa] sm:$0xff] }
  0x68   : > { %v909_v43 = vadd.f32 %v877_v59, %v804_v23  ;;  %v716_v50 = vadd.f32 %v684_v12, %v612_v24  ;;  %v372_v46 = vmul.f32 %v2492_v45, %v2035_v2  ;;  %v997_v18 = vmul.f32 %v2077_v15, %v2668_v27  ;;  %v2713_v24 = vld [vmem:[%s2045_s27 + $0x168] sm:$0xff] }
  0x69   : > { %1911 = vmatprep.mubr.msk.f32.mxu1 %vm1141_vm1, %v1132_v39  ;;  %v773_v56 = vmul.f32 %v2587_v17, %v2060_v6  ;;  %v476_v55 = vmul.f32 %v2503_v9, %v2040_v3  ;;  %v581_v37 = vmul.f32 %v2601_v0, %v2050_v4  ;;  %v597_v45 = vadd.f32 %v565_v47, %v492_v30  ;;  %v2716_v60 = vld [vmem:[%s2045_s27 + $0x169] sm:$0xff] }
  0x6a   : > { %v1013_v7 = vadd.f32 %v981_v26, %v909_v43  ;;  %v820_v20 = vadd.f32 %v788_v41, %v716_v50  ;;  %v404_v36 = vadd.f32 %v372_v46, %v268_v62  ;;  %v1101_v59 = vmul.f32 %v2082_v16, %v2682_v42  ;;  %v2727_v50 = vld [vmem:[%s2045_s27 + $0x16a] sm:$0xff] }
  0x6b   : > { %v878_v13 = vmul.f32 %v2068_v10, %v2685_v53  ;;  %v685_v9 = vmul.f32 %v2604_v61, %v2055_v5  ;;  %v253_v35 = vmul.f32 %v2517_v57, %v2030_v1  ;;  %v701_v12 = vadd.f32 %v669_v38, %v597_v45 }
  0x6c   : > { %v1117_v11 = vadd.f32 %v1085_v25, %v1013_v7  ;;  %v925_v49 = vadd.f32 %v893_v32, %v820_v20  ;;  %v508_v51 = vadd.f32 %v476_v55, %v404_v36  ;;  %v982_v52 = vmul.f32 %v2077_v15, %v2696_v34  ;;  %v2741_v20 = vld [vmem:[%s2045_s27 + $0xb0] sm:$0xff] }
  0x6d   : > { %v1086_v54 = vmul.f32 %v2082_v16, %v2699_v8  ;;  %v357_v63 = vmul.f32 %v2528_v44, %v2035_v2  ;;  %v461_v57 = vmul.f32 %v2531_v58, %v2040_v3  ;;  %v805_v25 = vadd.f32 %v773_v56, %v701_v12 }
  0x6e   : > { %1888 = vmatmul.mubr.msk.f32.gmra.mrb[8].mxu0 %vm1141_vm1, %v1117_v11  ;;  %v1029_v26 = vadd.f32 %v997_v18, %v925_v49  ;;  %v613_v41 = vadd.f32 %v581_v37, %v508_v51  ;;  %v789_v23 = vmul.f32 %v2615_v31, %v2060_v6  ;;  %v894_v47 = vmul.f32 %v2068_v10, %v2713_v24 }
  0x6f   : > { %v998_v44 = vmul.f32 %v2077_v15, %v2716_v60  ;;  %v389_v58 = vadd.f32 %v357_v63, %v253_v35  ;;  %v566_v39 = vmul.f32 %v2629_v22, %v2050_v4  ;;  %v910_v38 = vadd.f32 %v878_v13, %v805_v25  ;;  %v2755_v35 = vld [vmem:[%s2045_s27 + $0xb2] sm:$0xff] }
  0x70   : > { %v1133_v32 = vadd.f32 %v1101_v59, %v1029_v26  ;;  %v717_v62 = vadd.f32 %v685_v9, %v613_v41  ;;  %v269_v43 = vmul.f32 %v2545_v19, %v2030_v1  ;;  %v670_v46 = vmul.f32 %v2640_v40, %v2055_v5  ;;  %v2796_v26 = vld [vmem:[%s3081_s1 + $0x6] ss:$0 sm:$0xff]  ;;  %v2803_v41 = vld [vmem:[%s3081_s1 + $0x4] ss:$0 sm:$0xff] }
  0x71   : > { %v493_v30 = vadd.f32 %v461_v57, %v389_v58  ;;  %v373_v18 = vmul.f32 %v2556_v28, %v2035_v2  ;;  %v477_v56 = vmul.f32 %v2570_v33, %v2040_v3  ;;  %v1014_v55 = vadd.f32 %v982_v52, %v910_v38 }
  0x72   : > { %1912 = vmatmul.mubr.msk.f32.gmra.mrb[8].mxu1 %vm1141_vm1, %v1133_v32  ;;  %v821_v37 = vadd.f32 %v789_v23, %v717_v62  ;;  %v1102_v19 = vmul.f32 %v2082_v16, %v2727_v50  ;;  %v774_v7 = vmul.f32 %v2643_v14, %v2060_v6  ;;  %v879_v2 = vmul.f32 %v2068_v10, %v2741_v20  ;;  %v2752_v6 = vld [vmem:[%s2045_s27 + $0xb1] sm:$0xff]  ;;  %v2760_v10 = vld [vmem:[%s3081_s1 + $0x1] ss:$0 sm:$0xff] }
  0x73   : > { %v598_v45 = vadd.f32 %v566_v39, %v493_v30  ;;  %v405_v28 = vadd.f32 %v373_v18, %v269_v43  ;;  %v582_v3 = vmul.f32 %v2657_v21, %v2050_v4  ;;  %v1118_v33 = vadd.f32 %v1086_v54, %v1014_v55  ;;  %v2784_v54 = vld [vmem:[%s2045_s27 + $0x170] sm:$0xff]  ;;  %v2823_v43 = vld [vmem:[%s3081_s1 + $0x7] ss:$0 sm:$0xff] }
  0x74   : > { %v926_v36 = vadd.f32 %v894_v47, %v821_v37  ;;  %v686_v59 = vmul.f32 %v2668_v27, %v2055_v5  ;;  %v254_v13 = vmul.f32 %v2573_v48, %v2030_v1  ;;  %v358_v4 = vmul.f32 %v2760_v10, %v2584_v29  ;;  %v2767_v5 = vld [vmem:[%s3081_s1 + $0x2] ss:$0 sm:$0xff]  ;;  %v2779_v29 = vld [vmem:[%s3081_s1 + $0x5] ss:$0 sm:$0xff]  ;;  %v2810_v47 = vld [vmem:[%s3081_s1] ss:$0 sm:$0xff] }
  0x75   : > { %v702_v9 = vadd.f32 %v670_v46, %v598_v45  ;;  %v509_v11 = vadd.f32 %v477_v56, %v405_v28  ;;  %v462_v1 = vmul.f32 %v2767_v5, %v2587_v17  ;;  %1890 = vmatprep.mubr.msk.f32.mxu0 %vm1141_vm1, %v1118_v33  ;;  %v983_v49 = vmul.f32 %v2077_v15, %v2752_v6  ;;  %v2789_v15 = vld [vmem:[%s3081_s1 + $0x3] ss:$0 sm:$0xff]  ;;  %v2815_v32 = vld [vmem:[%s2045_s27 + $0x171] sm:$0xff]  ;;  %v2842_v45 = vld [vmem:[%s3081_s1 + $0x8] ss:$0 sm:$0xff] }
  0x76   : > { %v1030_v48 = vadd.f32 %v998_v44, %v926_v36  ;;  %v1087_v12 = vmul.f32 %v2082_v16, %v2755_v35  ;;  %v790_v51 = vmul.f32 %v2779_v29, %v2682_v42  ;;  %v390_v63 = vadd.f32 %v358_v4, %v254_v13  ;;  %v2834_v55 = vld [vmem:[%s2045_s27 + $0x172] sm:$0xff]  ;;  %v1749_v13 = vld [vmem:[%s2045_s27 + $0xc1] sm:$0xff] }
  0x77   : > { %v806_v52 = vadd.f32 %v774_v7, %v702_v9  ;;  %v614_v17 = vadd.f32 %v582_v3, %v509_v11  ;;  %v567_v16 = vmul.f32 %v2789_v15, %v2685_v53  ;;  %v895_v25 = vmul.f32 %v2796_v26, %v2784_v54  ;;  %v2854_v9 = vld [vmem:[%s2045_s27 + $0xc2] sm:$0xff] }
  0x78   : > { %v1134_v57 = vadd.f32 %v1102_v19, %v1030_v48  ;;  %v671_v23 = vmul.f32 %v2803_v41, %v2696_v34  ;;  %v270_v44 = vmul.f32 %v2810_v47, %v2601_v0  ;;  %v494_v38 = vadd.f32 %v462_v1, %v390_v63  ;;  %v2837_v19 = vld [vmem:[%s2045_s27 + $0xc0] sm:$0xff] }
  0x79   : > { %v911_v58 = vadd.f32 %v879_v2, %v806_v52  ;;  %v718_v39 = vadd.f32 %v686_v59, %v614_v17  ;;  %v374_v62 = vmul.f32 %v2760_v10, %v2604_v61  ;;  %v999_v30 = vmul.f32 %v2823_v43, %v2815_v32  ;;  %v1731_v17 = vld [vmem:[%s2045_s27 + $0x180] sm:$0xff] }
  0x7a   : > { %1914 = vmatprep.mubr.msk.f32.mxu1 %vm1141_vm1, %v1134_v57  ;;  %v775_v0 = vmul.f32 %v2779_v29, %v2699_v8  ;;  %v478_v46 = vmul.f32 %v2767_v5, %v2615_v31  ;;  %v583_v61 = vmul.f32 %v2789_v15, %v2713_v24  ;;  %v599_v37 = vadd.f32 %v567_v16, %v494_v38  ;;  %v2868_v63 = vld [vmem:[%s2045_s27 + $0x181] sm:$0xff] }
  0x7b   : > { %v1015_v18 = vadd.f32 %v983_v49, %v911_v58  ;;  %v822_v56 = vadd.f32 %v790_v51, %v718_v39  ;;  %v406_v7 = vadd.f32 %v374_v62, %v270_v44  ;;  %v1103_v31 = vmul.f32 %v2842_v45, %v2834_v55  ;;  %v2878_v39 = vld [vmem:[%s2045_s27 + $0x182] sm:$0xff] }
  0x7c   : > { %v880_v2 = vmul.f32 %v2796_v26, %v2837_v19  ;;  %v687_v28 = vmul.f32 %v2803_v41, %v2716_v60  ;;  %v255_v3 = vmul.f32 %v2810_v47, %v2629_v22  ;;  %v703_v59 = vadd.f32 %v671_v23, %v599_v37 }
  0x7d   : > { %v1119_v33 = vadd.f32 %v1087_v12, %v1015_v18  ;;  %v927_v36 = vadd.f32 %v895_v25, %v822_v56  ;;  %v510_v11 = vadd.f32 %v478_v46, %v406_v7  ;;  %v984_v4 = vmul.f32 %v2823_v43, %v1749_v13  ;;  %v2892_v56 = vld [vmem:[%s2045_s27 + $0xc8] sm:$0xff] }
  0x7e   : > { %v1088_v1 = vmul.f32 %v2842_v45, %v2854_v9  ;;  %v359_v48 = vmul.f32 %v2760_v10, %v2640_v40  ;;  %v463_v22 = vmul.f32 %v2767_v5, %v2643_v14  ;;  %v807_v12 = vadd.f32 %v775_v0, %v703_v59  ;;  %v2906_v59 = vld [vmem:[%s2045_s27 + $0xca] sm:$0xff] }
  0x7f   : > { %1891 = vmatmul.mubr.msk.f32.gmra.mrb[10].mxu0 %vm1141_vm1, %v1119_v33  ;;  %v1031_v49 = vadd.f32 %v999_v30, %v927_v36  ;;  %v615_v51 = vadd.f32 %v583_v61, %v510_v11  ;;  %v791_v52 = vmul.f32 %v2779_v29, %v2727_v50  ;;  %v896_v16 = vmul.f32 %v2796_v26, %v1731_v17  ;;  %v2903_v36 = vld [vmem:[%s2045_s27 + $0xc9] sm:$0xff] }
  0x80   : > { %v1000_v40 = vmul.f32 %v2823_v43, %v2868_v63  ;;  %v391_v57 = vadd.f32 %v359_v48, %v255_v3  ;;  %v568_v14 = vmul.f32 %v2789_v15, %v2741_v20  ;;  %v912_v23 = vadd.f32 %v880_v2, %v807_v12 }
  0x81   : > { %v1135_v25 = vadd.f32 %v1103_v31, %v1031_v49  ;;  %v719_v44 = vadd.f32 %v687_v28, %v615_v51  ;;  %v271_v58 = vmul.f32 %v2810_v47, %v2657_v21  ;;  %v672_v62 = vmul.f32 %v2803_v41, %v2752_v6 }
  0x82   : > { %v495_v38 = vadd.f32 %v463_v22, %v391_v57  ;;  %v375_v30 = vmul.f32 %v2760_v10, %v2668_v27  ;;  %v479_v0 = vmul.f32 %v2767_v5, %v2682_v42  ;;  %v1016_v46 = vadd.f32 %v984_v4, %v912_v23 }
  0x83   : > { %1915 = vmatmul.mubr.msk.f32.gmra.mrb[10].mxu1 %vm1141_vm1, %v1135_v25  ;;  %v823_v61 = vadd.f32 %v791_v52, %v719_v44  ;;  %v1104_v21 = vmul.f32 %v2842_v45, %v2878_v39  ;;  %v776_v18 = vmul.f32 %v2779_v29, %v2755_v35  ;;  %v881_v27 = vmul.f32 %v2796_v26, %v2892_v56  ;;  %v2930_v44 = vld [vmem:[%s2045_s27 + $0x189] sm:$0xff] }
  0x84   : > { %v600_v37 = vadd.f32 %v568_v14, %v495_v38  ;;  %v407_v7 = vadd.f32 %v375_v30, %v271_v58  ;;  %v584_v42 = vmul.f32 %v2789_v15, %v2784_v54  ;;  %v1120_v31 = vadd.f32 %v1088_v1, %v1016_v46  ;;  %v1717_v38 = vld [vmem:[%s2045_s27 + $0xd8] sm:$0xff] }
  0x85   : > { %v928_v2 = vadd.f32 %v896_v16, %v823_v61  ;;  %v688_v28 = vmul.f32 %v2803_v41, %v2815_v32  ;;  %v256_v3 = vmul.f32 %v2810_v47, %v2685_v53  ;;  %v360_v4 = vmul.f32 %v2760_v10, %v2696_v34  ;;  %v2920_v34 = vld [vmem:[%s2045_s27 + $0x188] sm:$0xff] }
  0x86   : > { %v704_v33 = vadd.f32 %v672_v62, %v600_v37  ;;  %v511_v11 = vadd.f32 %v479_v0, %v407_v7  ;;  %v464_v1 = vmul.f32 %v2767_v5, %v2699_v8  ;;  %1893 = vmatprep.mubr.msk.f32.mxu0 %vm1141_vm1, %v1120_v31  ;;  %v985_v22 = vmul.f32 %v2823_v43, %v2903_v36  ;;  %v1800_v61 = vld [vmem:[%s2045_s27 + $0x18a] sm:$0xff]  ;;  %v1785_v31 = vld [vmem:[%s2045_s27 + $0xda] sm:$0xff] }
  0x87   : > { %v1032_v48 = vadd.f32 %v1000_v40, %v928_v2  ;;  %v1089_v53 = vmul.f32 %v2842_v45, %v2906_v59  ;;  %v792_v49 = vmul.f32 %v2779_v29, %v2834_v55  ;;  %v392_v52 = vadd.f32 %v360_v4, %v256_v3 }
  0x88   : > { %v808_v12 = vadd.f32 %v776_v18, %v704_v33  ;;  %v616_v51 = vadd.f32 %v584_v42, %v511_v11  ;;  %v569_v8 = vmul.f32 %v2789_v15, %v2837_v19  ;;  %v897_v40 = vmul.f32 %v2796_v26, %v2920_v34 }
  0x89   : > { %v1136_v16 = vadd.f32 %v1104_v21, %v1032_v48  ;;  %v673_v57 = vmul.f32 %v2803_v41, %v1749_v13  ;;  %v272_v14 = vmul.f32 %v2810_v47, %v2713_v24  ;;  %v496_v58 = vadd.f32 %v464_v1, %v392_v52 }
  0x8a   : > { %v913_v25 = vadd.f32 %v881_v27, %v808_v12  ;;  %v720_v23 = vadd.f32 %v688_v28, %v616_v51  ;;  %v376_v19 = vmul.f32 %v2760_v10, %v2716_v60  ;;  %v1001_v62 = vmul.f32 %v2823_v43, %v2930_v44  ;;  %v1751_v60 = vld [vmem:[%s2045_s27 + $0xd9] sm:$0xff] }
  0x8b   : > { %1917 = vmatprep.mubr.msk.f32.mxu1 %vm1141_vm1, %v1136_v16  ;;  %v777_v13 = vmul.f32 %v2779_v29, %v2854_v9  ;;  %v480_v24 = vmul.f32 %v2767_v5, %v2727_v50  ;;  %v585_v30 = vmul.f32 %v2789_v15, %v1731_v17  ;;  %v601_v21 = vadd.f32 %v569_v8, %v496_v58  ;;  %v1733_v28 = vld [vmem:[%s2045_s27 + $0x198] sm:$0xff] }
  0x8c   : > { %v1017_v0 = vadd.f32 %v985_v22, %v913_v25  ;;  %v824_v46 = vadd.f32 %v792_v49, %v720_v23  ;;  %v408_v18 = vadd.f32 %v376_v19, %v272_v14  ;;  %v1105_v37 = vmul.f32 %v2842_v45, %v1800_v61  ;;  %v1801_v8 = vld [vmem:[%s2045_s27 + $0x19a] sm:$0xff] }
  0x8d   : > { %v882_v27 = vmul.f32 %v2796_v26, %v1717_v38  ;;  %v689_v9 = vmul.f32 %v2803_v41, %v2868_v63  ;;  %v257_v7 = vmul.f32 %v2810_v47, %v2741_v20  ;;  %v705_v42 = vadd.f32 %v673_v57, %v601_v21 }
  0x8e   : > { %v1121_v50 = vadd.f32 %v1089_v53, %v1017_v0  ;;  %v929_v17 = vadd.f32 %v897_v40, %v824_v46  ;;  %v512_v2 = vadd.f32 %v480_v24, %v408_v18  ;;  %v986_v3 = vmul.f32 %v2823_v43, %v1751_v60  ;;  %v1767_v53 = vld [vmem:[%s2045_s27 + $0x199] sm:$0xff]  ;;  %v1786_v24 = vld [vmem:[%s2045_s27 + $0xe2] sm:$0xff] }
  0x8f   : > { %v361_v33 = vmul.f32 %v2760_v10, %v2752_v6  ;;  %v465_v11 = vmul.f32 %v2767_v5, %v2755_v35  ;;  %v809_v20 = vadd.f32 %v777_v13, %v705_v42  ;;  %v793_v1 = vmul.f32 %v2779_v29, %v2878_v39  ;;  %v1768_v60 = vld [vmem:[%s2045_s27 + $0x1a1] sm:$0xff] }
  0x90   : > { %1894 = vmatmul.mubr.msk.f32.gmra.mrb[12].mxu0 %vm1141_vm1, %v1121_v50  ;;  %v1033_v63 = vadd.f32 %v1001_v62, %v929_v17  ;;  %v617_v4 = vadd.f32 %v585_v30, %v512_v2  ;;  %v1090_v48 = vmul.f32 %v2842_v45, %v1785_v31  ;;  %v898_v22 = vmul.f32 %v2796_v26, %v1733_v28  ;;  %v1734_v30 = vld [vmem:[%s2045_s27 + $0x1a0] sm:$0xff] }
  0x91   : > { %v393_v49 = vadd.f32 %v361_v33, %v257_v7  ;;  %v570_v6 = vmul.f32 %v2789_v15, %v2892_v56  ;;  %v914_v35 = vadd.f32 %v882_v27, %v809_v20  ;;  %v273_v52 = vmul.f32 %v2810_v47, %v2784_v54  ;;  %v1718_v54 = vld [vmem:[%s2045_s27 + $0xe0] sm:$0xff] }
  0x92   : > { %v1137_v12 = vadd.f32 %v1105_v37, %v1033_v63  ;;  %v721_v51 = vadd.f32 %v689_v9, %v617_v4  ;;  %v674_v39 = vmul.f32 %v2803_v41, %v2903_v36  ;;  %v377_v40 = vmul.f32 %v2760_v10, %v2815_v32 }
  0x93   : > { %v497_v16 = vadd.f32 %v465_v11, %v393_v49  ;;  %v481_v57 = vmul.f32 %v2767_v5, %v2834_v55  ;;  %v1018_v56 = vadd.f32 %v986_v3, %v914_v35  ;;  %v1002_v25 = vmul.f32 %v2823_v43, %v1767_v53  ;;  %v1752_v55 = vld [vmem:[%s2045_s27 + $0xe1] sm:$0xff] }
  0x94   : > { %1918 = vmatmul.mubr.msk.f32.gmra.mrb[12].mxu1 %vm1141_vm1, %v1137_v12  ;;  %v825_v14 = vadd.f32 %v793_v1, %v721_v51  ;;  %v778_v23 = vmul.f32 %v2779_v29, %v2906_v59  ;;  %v409_v36 = vadd.f32 %v377_v40, %v273_v52  ;;  %v586_v10 = vmul.f32 %v2789_v15, %v2920_v34 }
  0x95   : > { %v602_v47 = vadd.f32 %v570_v6, %v497_v16  ;;  %v1122_v32 = vadd.f32 %v1090_v48, %v1018_v56  ;;  %v1106_v5 = vmul.f32 %v2842_v45, %v1801_v8  ;;  %v883_v19 = vmul.f32 %v2796_v26, %v1718_v54 }
  0x96   : > { %v930_v58 = vadd.f32 %v898_v22, %v825_v14  ;;  %v513_v62 = vadd.f32 %v481_v57, %v409_v36  ;;  %v690_v13 = vmul.f32 %v2803_v41, %v2930_v44  ;;  %v987_v34 = vmul.f32 %v2823_v43, %v1752_v55  ;;  %v1802_v44 = vld [vmem:[%s2045_s27 + $0x1a2] sm:$0xff] }
  0x97   : > { %v706_v38 = vadd.f32 %v674_v39, %v602_v47  ;;  %1896 = vmatprep.mubr.msk.f32.mxu0 %vm1141_vm1, %v1122_v32  ;;  %v794_v46 = vmul.f32 %v2779_v29, %v1800_v61  ;;  %v1091_v37 = vmul.f32 %v2842_v45, %v1786_v24  ;;  %v899_v41 = vmul.f32 %v2796_v26, %v1734_v30 }
  0x98   : > { %v1034_v59 = vadd.f32 %v1002_v25, %v930_v58  ;;  %v618_v0 = vadd.f32 %v586_v10, %v513_v62  ;;  %v1003_v50 = vmul.f32 %v2823_v43, %v1768_v60  ;;  %v1107_v29 = vmul.f32 %v2842_v45, %v1802_v44 }
  0x99   : > { %v810_v15 = vadd.f32 %v778_v23, %v706_v38 }
  0x9a   : > { %v1138_v21 = vadd.f32 %v1106_v5, %v1034_v59  ;;  %v722_v27 = vadd.f32 %v690_v13, %v618_v0 }
  0x9b   : > { %v915_v18 = vadd.f32 %v883_v19, %v810_v15 }
  0x9c   : > { %1920 = vmatprep.mubr.msk.f32.mxu1 %vm1141_vm1, %v1138_v21  ;;  %v826_v7 = vadd.f32 %v794_v46, %v722_v27 }
  0x9d   : > { %v1019_v9 = vadd.f32 %v987_v34, %v915_v18 }
  0x9e   : > { %v931_v42 = vadd.f32 %v899_v41, %v826_v7 }
  0x9f   : > { %v1123_v17 = vadd.f32 %v1091_v37, %v1019_v9 }
  0xa0   : > { %v1035_v61 = vadd.f32 %v1003_v50, %v931_v42 }
  0xa1   : > { %1897 = vmatmul.mubr.msk.f32.gmra.mrb[14].mxu0 %vm1141_vm1, %v1123_v17 }
  0xa2   : > { %v1139_v31 = vadd.f32 %v1107_v29, %v1035_v61 }
  0xa4   : > { %1921 = vmatmul.mubr.msk.f32.gmra.mrb[14].mxu1 %vm1141_vm1, %v1139_v31 }
  0xfd   : > { %v1877_v26 = vpop.f32.mrb[0].mxu0 }
  0xfe   : > { %1469 = vst.msk [vmem:[%s3005_s16 + $0x8] sm:$0xff] %vm1467_vm2, %v1877_v26  ;;  %v1308_v43 = vpop.f32.mrb[1].mxu0 }
  0xff   : > { %1468 = vst.msk [vmem:[%s3005_s16] sm:$0xff] %vm1467_vm2, %v1308_v43 }
 0x100   : > { %v1901_v45 = vpop.f32.mrb[0].mxu1 }
 0x101   : > { %1485 = vst.msk [vmem:[%s3005_s16 + $0x88] sm:$0xff] %vm1467_vm2, %v1901_v45  ;;  %v1388_v2 = vpop.f32.mrb[1].mxu1 }
 0x102   : > { %1484 = vst.msk [vmem:[%s3005_s16 + $0x80] sm:$0xff] %vm1467_vm2, %v1388_v2 }
 0x10e   : > { %v1880_v28 = vpop.f32.mrb[2].mxu0 }
 0x10f   : > { %1471 = vst.msk [vmem:[%s3005_s16 + $0x18] sm:$0xff] %vm1467_vm2, %v1880_v28  ;;  %v1318_v3 = vpop.f32.mrb[3].mxu0 }
 0x110   : > { %1470 = vst.msk [vmem:[%s3005_s16 + $0x10] sm:$0xff] %vm1467_vm2, %v1318_v3 }
 0x111   : > { %v1904_v33 = vpop.f32.mrb[2].mxu1 }
 0x112   : > { %1487 = vst.msk [vmem:[%s3005_s16 + $0x98] sm:$0xff] %vm1467_vm2, %v1904_v33  ;;  %v1398_v11 = vpop.f32.mrb[3].mxu1 }
 0x113   : > { %1486 = vst.msk [vmem:[%s3005_s16 + $0x90] sm:$0xff] %vm1467_vm2, %v1398_v11 }
 0x11f   : > { %v1883_v63 = vpop.f32.mrb[4].mxu0 }
 0x120   : > { %1473 = vst.msk [vmem:[%s3005_s16 + $0x28] sm:$0xff] %vm1467_vm2, %v1883_v63  ;;  %v1328_v20 = vpop.f32.mrb[5].mxu0 }
 0x121   : > { %1472 = vst.msk [vmem:[%s3005_s16 + $0x20] sm:$0xff] %vm1467_vm2, %v1328_v20 }
 0x123   : > { %v1907_v4 = vpop.f32.mrb[4].mxu1 }
 0x124   : > { %1489 = vst.msk [vmem:[%s3005_s16 + $0xa8] sm:$0xff] %vm1467_vm2, %v1907_v4  ;;  %v1408_v1 = vpop.f32.mrb[5].mxu1 }
 0x125   : > { %1488 = vst.msk [vmem:[%s3005_s16 + $0xa0] sm:$0xff] %vm1467_vm2, %v1408_v1 }
 0x130   : > { %v1886_v48 = vpop.f32.mrb[6].mxu0 }
 0x131   : > { %1475 = vst.msk [vmem:[%s3005_s16 + $0x38] sm:$0xff] %vm1467_vm2, %v1886_v48  ;;  %v1338_v22 = vpop.f32.mrb[7].mxu0 }
 0x132   : > { %1474 = vst.msk [vmem:[%s3005_s16 + $0x30] sm:$0xff] %vm1467_vm2, %v1338_v22 }
 0x134   : > { %v1910_v53 = vpop.f32.mrb[6].mxu1 }
 0x135   : > { %1491 = vst.msk [vmem:[%s3005_s16 + $0xb8] sm:$0xff] %vm1467_vm2, %v1910_v53  ;;  %v1418_v49 = vpop.f32.mrb[7].mxu1 }
 0x136   : > { %1490 = vst.msk [vmem:[%s3005_s16 + $0xb0] sm:$0xff] %vm1467_vm2, %v1418_v49 }
 0x141   : > { %v1889_v6 = vpop.f32.mrb[8].mxu0 }
 0x142   : > { %1477 = vst.msk [vmem:[%s3005_s16 + $0x48] sm:$0xff] %vm1467_vm2, %v1889_v6  ;;  %v1348_v12 = vpop.f32.mrb[9].mxu0 }
 0x143   : > { %1476 = vst.msk [vmem:[%s3005_s16 + $0x40] sm:$0xff] %vm1467_vm2, %v1348_v12 }
 0x145   : > { %v1913_v35 = vpop.f32.mrb[8].mxu1 }
 0x146   : > { %1493 = vst.msk [vmem:[%s3005_s16 + $0xc8] sm:$0xff] %vm1467_vm2, %v1913_v35  ;;  %v1428_v51 = vpop.f32.mrb[9].mxu1 }
 0x147   : > { %1492 = vst.msk [vmem:[%s3005_s16 + $0xc0] sm:$0xff] %vm1467_vm2, %v1428_v51 }
 0x152   : > { %v1892_v52 = vpop.f32.mrb[10].mxu0 }
 0x153   : > { %1479 = vst.msk [vmem:[%s3005_s16 + $0x58] sm:$0xff] %vm1467_vm2, %v1892_v52  ;;  %v1358_v8 = vpop.f32.mrb[11].mxu0 }
 0x154   : > { %1478 = vst.msk [vmem:[%s3005_s16 + $0x50] sm:$0xff] %vm1467_vm2, %v1358_v8 }
 0x156   : > { %v1916_v16 = vpop.f32.mrb[10].mxu1 }
 0x157   : > { %1495 = vst.msk [vmem:[%s3005_s16 + $0xd8] sm:$0xff] %vm1467_vm2, %v1916_v16  ;;  %v1438_v39 = vpop.f32.mrb[11].mxu1 }
 0x158   : > { %1494 = vst.msk [vmem:[%s3005_s16 + $0xd0] sm:$0xff] %vm1467_vm2, %v1438_v39 }
 0x163   : > { %v1895_v40 = vpop.f32.mrb[12].mxu0 }
 0x164   : > { %1481 = vst.msk [vmem:[%s3005_s16 + $0x68] sm:$0xff] %vm1467_vm2, %v1895_v40  ;;  %v1368_v57 = vpop.f32.mrb[13].mxu0 }
 0x165   : > { %1480 = vst.msk [vmem:[%s3005_s16 + $0x60] sm:$0xff] %vm1467_vm2, %v1368_v57 }
 0x167   : > { %v1919_v56 = vpop.f32.mrb[12].mxu1 }
 0x168   : > { %1497 = vst.msk [vmem:[%s3005_s16 + $0xe8] sm:$0xff] %vm1467_vm2, %v1919_v56  ;;  %v1448_v14 = vpop.f32.mrb[13].mxu1 }
 0x169   : > { %1496 = vst.msk [vmem:[%s3005_s16 + $0xe0] sm:$0xff] %vm1467_vm2, %v1448_v14 }
 0x174   : > { %v1898_v25 = vpop.f32.mrb[14].mxu0 }
 0x175   : > { %1483 = vst.msk [vmem:[%s3005_s16 + $0x78] sm:$0xff] %vm1467_vm2, %v1898_v25  ;;  %v1378_v54 = vpop.f32.mrb[15].mxu0 }
 0x176   : > { %1482 = vst.msk [vmem:[%s3005_s16 + $0x70] sm:$0xff] %vm1467_vm2, %v1378_v54 }
 0x177   : > { %v1922_v47 = vpop.f32.mrb[14].mxu1 }
 0x178   : > { %1499 = vst.msk [vmem:[%s3005_s16 + $0xf8] sm:$0xff] %vm1467_vm2, %v1922_v47  ;;  %v1458_v23 = vpop.f32.mrb[15].mxu1 }
 0x179   : > { %1498 = vst.msk [vmem:[%s3005_s16 + $0xf0] sm:$0xff] %vm1467_vm2, %v1458_v23 }
 0x17a PF: > { %s13_s14 = sadd.s32 1, %s1981_s14   ;;  %s3084_s12 = smov %s1977_s13 }
 0x17b   : > { %p10_p5 = scmp.ge.s32.totalorder %s13_s14, 4   ;;  %s3085_s13 = smov %s3087_s15 }
 0x17d   :  { %12 = sbr.rel (!%p10_p5) target bundleno = 2 (0x2), region = 72 }

</bundles_post_ra>
